<compile_context>
chip_gen: v7x
topology: tpu7x:2x2x1
jax: 0.10.0
libtpu: 0.0.40
codegen_flags: <defaults>
</compile_context>

<pallas_src>
import jax
import jax.numpy as jnp
from jax import lax
from jax.experimental import pallas as pl
from jax.experimental.pallas import tpu as pltpu


# ----------------------------------------------------------------------------
# Constants / helpers
# ----------------------------------------------------------------------------
M_TILE = 8          # batch tile = one f32 sublane tile
_W_ROW_ALIGN = 16   # bf16 packs 16 rows into one (8, 128) vreg tile


def _round_up(x, m):
    return (x + m - 1) // m * m


def pool_matrix(d):
    # AvgPool1d(kernel_size=2, stride=2) along the feature axis as a matmul.
    idx = jnp.arange(d)
    return jnp.zeros((d, d // 2), jnp.float32).at[idx, idx // 2].set(0.5)


# ----------------------------------------------------------------------------
# Wrapper-time packing: fold affine layers, pack params into 2 contiguous slabs
# ----------------------------------------------------------------------------
def pack_params(p, m_tile=M_TILE):
    """Fold consecutive affine layers and pack everything into two slabs.

    Only valid because seq_len == 1: softmax over a single key is exactly 1,
    so MultiheadAttention(q, kv, kv) == out_proj(value_proj(kv)) and
    SelfAttention(x) == value(x).  The query/key projections (and seq1) are
    provably dead and are NOT packed.

    Returns (w_slab_bf16, b_slab_f32, w_layout, b_layout):
      w_layout[name] = (row0, K, N)  static offsets into the weight slab
      b_layout[name] = (row0, N)     static offsets into the bias slab
                                     (each vector occupies m_tile identical rows)
    """
    E = p["mha_wv"].shape[0]

    # ---- exact offline affine folding ---------------------------------------
    w_mha = p["mha_wv"] @ p["mha_wo"]                    # value_proj ∘ out_proj
    b_mha = p["mha_bv"] @ p["mha_wo"] + p["mha_bo"]
    P1, P2, P3 = pool_matrix(E), pool_matrix(E // 2), pool_matrix(E // 4)
    w_sapool = p["sa_wv"] @ P1                           # SelfAttention value ∘ pool1
    b_sapool = p["sa_bv"] @ P1

    weights = [
        ("seq2", p["ca_seq2_w"]), ("mha", w_mha),
        ("rb1_fc1", p["rb1_fc1_w"]), ("rb1_fc2", p["rb1_fc2_w"]),
        ("sapool", w_sapool),
        ("rb2_fc1", p["rb2_fc1_w"]), ("rb2_fc2", p["rb2_fc2_w"]), ("pool2", P2),
        ("rb3_fc1", p["rb3_fc1_w"]), ("rb3_fc2", p["rb3_fc2_w"]), ("pool3", P3),
        ("rb4_fc1", p["rb4_fc1_w"]), ("rb4_fc2", p["rb4_fc2_w"]),
        ("cls1", p["cls1_w"]), ("cls2", p["cls2_w"]),
    ]
    biases = [
        ("seq2", p["ca_seq2_b"]), ("mha", b_mha),
        ("rb1_b1", p["rb1_fc1_b"]), ("rb1_g1", p["rb1_g1"]), ("rb1_be1", p["rb1_be1"]),
        ("rb1_b2", p["rb1_fc2_b"]), ("rb1_g2", p["rb1_g2"]), ("rb1_be2", p["rb1_be2"]),
        ("sapool", b_sapool),
        ("rb2_b1", p["rb2_fc1_b"]), ("rb2_g1", p["rb2_g1"]), ("rb2_be1", p["rb2_be1"]),
        ("rb2_b2", p["rb2_fc2_b"]), ("rb2_g2", p["rb2_g2"]), ("rb2_be2", p["rb2_be2"]),
        ("rb3_b1", p["rb3_fc1_b"]), ("rb3_g1", p["rb3_g1"]), ("rb3_be1", p["rb3_be1"]),
        ("rb3_b2", p["rb3_fc2_b"]), ("rb3_g2", p["rb3_g2"]), ("rb3_be2", p["rb3_be2"]),
        ("rb4_b1", p["rb4_fc1_b"]), ("rb4_g1", p["rb4_g1"]), ("rb4_be1", p["rb4_be1"]),
        ("rb4_b2", p["rb4_fc2_b"]), ("rb4_g2", p["rb4_g2"]), ("rb4_be2", p["rb4_be2"]),
        ("cls1", p["cls1_b"]), ("cls2", p["cls2_b"]),
    ]

    lanes = _round_up(max(max(w.shape[1] for _, w in weights),
                          max(b.shape[-1] for _, b in biases)), 128)

    # weight slab (bf16): each block's row start aligned to the packed bf16 tile
    w_layout, blocks, row = {}, [], 0
    for name, wgt in weights:
        k, n = wgt.shape
        w_layout[name] = (row, k, n)
        blk = jnp.zeros((_round_up(k, _W_ROW_ALIGN), lanes), jnp.float32)
        blk = blk.at[:k, :n].set(wgt)
        blocks.append(blk)
        row += blk.shape[0]
    w_slab = jnp.concatenate(blocks, axis=0).astype(jnp.bfloat16)

    # bias / gamma / beta slab (f32): each vector pre-broadcast to m_tile rows
    # so every in-kernel add/mul is exact-shape (no broadcast_in_dim per use).
    b_layout, rows = {}, []
    for i, (name, b) in enumerate(biases):
        n = b.shape[-1]
        b_layout[name] = (i * m_tile, n)
        r = jnp.zeros((1, lanes), jnp.float32).at[0, :n].set(b.reshape(-1))
        rows.append(jnp.broadcast_to(r, (m_tile, lanes)))
    b_slab = jnp.concatenate(rows, axis=0)

    return w_slab, b_slab, w_layout, b_layout


# ----------------------------------------------------------------------------
# Kernel
# ----------------------------------------------------------------------------
def build_kernel(w_layout, b_layout, m_tile=M_TILE):
    def kernel(seq2_ref, w_ref, b_ref, out_ref):
        def weight(name):
            r0, k, n = w_layout[name]
            return w_ref[r0:r0 + k, :n]                  # bf16 (k, n), static slice

        def vec(name):
            r0, n = b_layout[name]
            return b_ref[r0:r0 + m_tile, :n]             # f32 (m_tile, n), pre-broadcast

        def linear(x, wname, bname):                     # bf16 MXU, f32 accumulate
            y = jnp.dot(x.astype(jnp.bfloat16), weight(wname),
                        preferred_element_type=jnp.float32)
            return y + vec(bname)

        def pool(x, wname):                              # bias-free pooling matmul
            return jnp.dot(x.astype(jnp.bfloat16), weight(wname),
                           preferred_element_type=jnp.float32)

        def leaky(x):                                    # LeakyReLU(0.1)
            return jnp.maximum(x, 0.1 * x)

        def layernorm(x, gname, bename):
            # Independent reductions: mu and E[x^2] both depend only on x, so
            # the two XLU cross-lane reduces issue back-to-back.  f32 stats.
            mu = jnp.mean(x, axis=-1, keepdims=True)
            ms = jnp.mean(x * x, axis=-1, keepdims=True)
            var = jnp.maximum(ms - mu * mu, 0.0)
            scale = lax.rsqrt(var + 1e-5) * vec(gname)   # gamma fused into scale (EUP rsqrt)
            return (x - mu) * scale + vec(bename)

        def resblock(x, t):
            out = leaky(layernorm(linear(x, f"{t}_fc1", f"{t}_b1"),
                                  f"{t}_g1", f"{t}_be1"))
            out = layernorm(linear(out, f"{t}_fc2", f"{t}_b2"),
                            f"{t}_g2", f"{t}_be2")
            return leaky(out + x)

        # ---- CrossAttention (query path dropped: softmax over 1 key == 1) ---
        kv = jnp.maximum(linear(seq2_ref[...], "seq2", "seq2"), 0.0)   # ReLU
        x = linear(kv, "mha", "mha")              # value_proj ∘ out_proj (folded)
        # ---- ResBlock1 / SelfAttention(value) ∘ pool1 (folded) --------------
        x = resblock(x, "rb1")
        x = linear(x, "sapool", "sapool")
        # ---- ResBlock2 / pool2 / ResBlock3 / pool3 / ResBlock4 --------------
        x = resblock(x, "rb2")
        x = pool(x, "pool2")    # kept as matmul; MXU has slack, XLU is the likely constraint
        x = resblock(x, "rb3")
        x = pool(x, "pool3")
        x = resblock(x, "rb4")
        # ---- classifier ------------------------------------------------------
        x = leaky(linear(x, "cls1", "cls1"))
        x = linear(x, "cls2", "cls2")
        out_ref[...] = x

    return kernel


# ----------------------------------------------------------------------------
# Wrapper
# ----------------------------------------------------------------------------
def protein_dna_classifier(seq2, w_slab, b_slab, w_layout, b_layout):
    # seq1 is intentionally not a kernel operand: with seq_len == 1 the
    # attention weights are exactly 1.0, so the query/key path cannot affect
    # the output; passing it would only add dead DMA traffic.
    B, D2 = seq2.shape
    cls = b_layout["cls2"][1]

    # Batch is the throughput lever: pad to the 8-row sublane tile and run a
    # batch grid (parallel across TCs once there are enough tiles).  At B=2
    # this is a single grid step; never megacore-split a sub-tile batch.
    M = _round_up(max(B, M_TILE), M_TILE)
    seq2_p = jnp.zeros((M, D2), jnp.float32).at[:B].set(seq2.astype(jnp.float32))
    grid = (M // M_TILE,)

    flops = 2 * M * sum(k * n for _, k, n in w_layout.values())
    bytes_accessed = seq2_p.size * 4 + w_slab.size * 2 + b_slab.size * 4 + M * cls * 4

    out = pl.pallas_call(
        build_kernel(w_layout, b_layout),
        out_shape=jax.ShapeDtypeStruct((M, cls), jnp.float32),
        grid=grid,
        in_specs=[
            pl.BlockSpec((M_TILE, D2), lambda i: (i, 0)),       # batch tile
            pl.BlockSpec(w_slab.shape, lambda i: (0, 0)),       # resident weight slab
            pl.BlockSpec(b_slab.shape, lambda i: (0, 0)),       # resident bias/LN slab
        ],
        out_specs=pl.BlockSpec((M_TILE, cls), lambda i: (i, 0)),
        compiler_params=pltpu.CompilerParams(dimension_semantics=("parallel",)),
        cost_estimate=pl.CostEstimate(flops=flops, transcendentals=8 * M,
                                      bytes_accessed=bytes_accessed),
    )(seq2_p, w_slab, b_slab)
    return jnp.squeeze(out[:B])   # matches logits.squeeze()


# ----------------------------------------------------------------------------
# Parameter construction (deterministic, synthetic, x @ W convention)
# ----------------------------------------------------------------------------
def make_params(key, dim1, dim2, E, cls, num_heads):
    keys = iter(jax.random.split(key, 64))

    def w(shape, scale=0.1):
        return scale * jax.random.normal(next(keys), shape, jnp.float32)

    p = {}
    # CrossAttention: seq1_linear, seq2_linear, full MHA (q/k/v/out projections)
    p["ca_seq1_w"], p["ca_seq1_b"] = w((dim1, E)), w((E,))
    p["ca_seq2_w"], p["ca_seq2_b"] = w((dim2, E)), w((E,))
    for n in ("q", "k", "v", "o"):
        p[f"mha_w{n}"], p[f"mha_b{n}"] = w((E, E)), w((E,))

    def rb(t, d):
        p[f"{t}_fc1_w"], p[f"{t}_fc1_b"] = w((d, d)), w((d,))
        p[f"{t}_g1"] = 1.0 + w((d,))       # non-trivial gamma/beta so the LN
        p[f"{t}_be1"] = w((d,))            # affine path is actually exercised
        p[f"{t}_fc2_w"], p[f"{t}_fc2_b"] = w((d, d)), w((d,))
        p[f"{t}_g2"] = 1.0 + w((d,))
        p[f"{t}_be2"] = w((d,))

    rb("rb1", E)
    # SelfAttention: full q/k/v (q/k are dead at seq_len==1 but used by the reference)
    for n in ("q", "k", "v"):
        p[f"sa_w{n}"], p[f"sa_b{n}"] = w((E, E)), w((E,))
    rb("rb2", E // 2)
    rb("rb3", E // 4)
    rb("rb4", E // 8)
    p["cls1_w"], p["cls1_b"] = w((E // 8, 128)), w((128,))
    p["cls2_w"], p["cls2_b"] = w((128, cls)), w((cls,))
    return p


# ----------------------------------------------------------------------------
# Pure-JAX f32 reference: FULL un-folded math (head split, softmax, q/k paths,
# true pair-average pooling) -- independently validates the kernel's folding.
# ----------------------------------------------------------------------------
def reference_forward(seq1, seq2, p, num_heads):
    B = seq1.shape[0]
    E = p["ca_seq2_w"].shape[1]
    relu = lambda x: jnp.maximum(x, 0.0)
    leaky = lambda x: jnp.maximum(x, 0.1 * x)
    lin = lambda x, w, b: x @ w + b

    def ln(x, g, b):
        mu = x.mean(-1, keepdims=True)
        var = ((x - mu) ** 2).mean(-1, keepdims=True)
        return (x - mu) / jnp.sqrt(var + 1e-5) * g + b

    def rb(x, t):
        out = leaky(ln(lin(x, p[f"{t}_fc1_w"], p[f"{t}_fc1_b"]), p[f"{t}_g1"], p[f"{t}_be1"]))
        out = ln(lin(out, p[f"{t}_fc2_w"], p[f"{t}_fc2_b"]), p[f"{t}_g2"], p[f"{t}_be2"])
        return leaky(out + x)

    # seq.unsqueeze(1): (B, L) -> (B, 1, L)
    s1, s2 = seq1[:, None, :], seq2[:, None, :]
    q_in = relu(lin(s1, p["ca_seq1_w"], p["ca_seq1_b"]))
    kv_in = relu(lin(s2, p["ca_seq2_w"], p["ca_seq2_b"]))

    # full multi-head attention (seq_len == 1 both sides)
    hd = E // num_heads
    split = lambda x: x.reshape(B, 1, num_heads, hd).transpose(0, 2, 1, 3)
    q = split(lin(q_in, p["mha_wq"], p["mha_bq"]))
    k = split(lin(kv_in, p["mha_wk"], p["mha_bk"]))
    v = split(lin(kv_in, p["mha_wv"], p["mha_bv"]))
    scores = (q @ k.transpose(0, 1, 3, 2)) / jnp.sqrt(float(hd))
    attn = jax.nn.softmax(scores, axis=-1)
    o = (attn @ v).transpose(0, 2, 1, 3).reshape(B, 1, E)
    x = lin(o, p["mha_wo"], p["mha_bo"])

    x = rb(x, "rb1")

    # full SelfAttention
    qs = lin(x, p["sa_wq"], p["sa_bq"])
    ks = lin(x, p["sa_wk"], p["sa_bk"])
    vs = lin(x, p["sa_wv"], p["sa_bv"])
    sc = (qs @ ks.transpose(0, 2, 1)) / jnp.sqrt(float(x.shape[-1]))
    x = jax.nn.softmax(sc, axis=-1) @ vs

    def avgpool(x):  # nn.AvgPool1d(2, 2) over the last axis of (B, 1, L)
        b, c, l = x.shape
        return x.reshape(b, c, l // 2, 2).mean(-1)

    x = avgpool(x)
    x = rb(x, "rb2"); x = avgpool(x)
    x = rb(x, "rb3"); x = avgpool(x)
    x = rb(x, "rb4")
    x = lin(leaky(lin(x, p["cls1_w"], p["cls1_b"])), p["cls2_w"], p["cls2_b"])
    return jnp.squeeze(x)


if __name__ == "__main__":
    B, D1, D2, E, CLS, HEADS = 2, 16, 24, 32, 1, 8
    key = jax.random.PRNGKey(0)
    k1, k2, k3 = jax.random.split(key, 3)
    seq1 = jax.random.normal(k1, (B, D1), jnp.float32)   # Protein (batch, length)
    seq2 = jax.random.normal(k2, (B, D2), jnp.float32)   # DNA     (batch, length)
    params = make_params(k3, D1, D2, E, CLS, HEADS)

    w_slab, b_slab, w_layout, b_layout = pack_params(params)
    out = protein_dna_classifier(seq2, w_slab, b_slab, w_layout, b_layout)
    out = jax.block_until_ready(out)

    ref = reference_forward(seq1, seq2, params, HEADS)
    assert out.shape == ref.shape == (B,)
    # tolerance accounts for bf16 matmul operands vs the f32 reference
    assert jnp.allclose(out, ref, atol=5e-2, rtol=5e-2), (out, ref)
    print("KERNEL_OK")
</pallas_src>

<mosaic_0001>
module attributes {stable_mosaic.version = 11 : i64} {
  func.func @kernel(%arg0: i32, %arg1: memref<8x24xf32, #tpu.memory_space<vmem>>, %arg2: memref<432x128xbf16, #tpu.memory_space<vmem>>, %arg3: memref<232x128xf32, #tpu.memory_space<vmem>>, %arg4: memref<8x1xf32, #tpu.memory_space<vmem>>) attributes {dimension_semantics = [#tpu.dimension_semantics<parallel>], iteration_bounds = array<i64: 1>, scalar_prefetch = 0 : i64, scratch_operands = 0 : i64, tpu.core_type = #tpu.core_type<tc>, window_params = [{transform_indices = @transform_0, window_bounds = array<i64: 8, 24>}, {pipeline_mode = #tpu.pipeline_mode<synchronous>, transform_indices = @transform_1, window_bounds = array<i64: 432, 128>}, {pipeline_mode = #tpu.pipeline_mode<synchronous>, transform_indices = @transform_2, window_bounds = array<i64: 232, 128>}, {transform_indices = @transform_3, window_bounds = array<i64: 8, 1>}]} {
    %c0 = arith.constant 0 : index
    %c0_0 = arith.constant 0 : index
    %0 = vector.load %arg1[%c0, %c0_0] : memref<8x24xf32, #tpu.memory_space<vmem>>, vector<8x24xf32>
    %1 = arith.truncf %0 : vector<8x24xf32> to vector<8x24xbf16>
    %c0_1 = arith.constant 0 : index
    %c0_2 = arith.constant 0 : index
    %2 = vector.load %arg2[%c0_1, %c0_2] : memref<432x128xbf16, #tpu.memory_space<vmem>>, vector<24x32xbf16>
    %cst = arith.constant dense<0.000000e+00> : vector<8x32xf32>
    %3 = tpu.matmul %1, %2, %cst {dimension_numbers = #tpu.dot_dimension_numbers<[1], [0], [0], [1], [0, 0, 1, 1], [], []>} : vector<8x24xbf16>, vector<24x32xbf16>, vector<8x32xf32> -> vector<8x32xf32>
    %c0_3 = arith.constant 0 : index
    %c0_4 = arith.constant 0 : index
    %4 = vector.load %arg3[%c0_3, %c0_4] : memref<232x128xf32, #tpu.memory_space<vmem>>, vector<8x32xf32>
    %5 = arith.addf %3, %4 : vector<8x32xf32>
    %cst_5 = arith.constant 0.000000e+00 : f32
    %6 = vector.broadcast %cst_5 : f32 to vector<8x32xf32>
    %7 = arith.maximumf %5, %6 : vector<8x32xf32>
    %8 = arith.truncf %7 : vector<8x32xf32> to vector<8x32xbf16>
    %c32 = arith.constant 32 : index
    %c0_6 = arith.constant 0 : index
    %9 = vector.load %arg2[%c32, %c0_6] : memref<432x128xbf16, #tpu.memory_space<vmem>>, vector<32x32xbf16>
    %cst_7 = arith.constant dense<0.000000e+00> : vector<8x32xf32>
    %10 = tpu.matmul %8, %9, %cst_7 {dimension_numbers = #tpu.dot_dimension_numbers<[1], [0], [0], [1], [0, 0, 1, 1], [], []>} : vector<8x32xbf16>, vector<32x32xbf16>, vector<8x32xf32> -> vector<8x32xf32>
    %c8 = arith.constant 8 : index
    %c0_8 = arith.constant 0 : index
    %11 = vector.load %arg3[%c8, %c0_8] : memref<232x128xf32, #tpu.memory_space<vmem>>, vector<8x32xf32>
    %12 = arith.addf %10, %11 : vector<8x32xf32>
    %13 = arith.truncf %12 : vector<8x32xf32> to vector<8x32xbf16>
    %c64 = arith.constant 64 : index
    %c0_9 = arith.constant 0 : index
    %14 = vector.load %arg2[%c64, %c0_9] : memref<432x128xbf16, #tpu.memory_space<vmem>>, vector<32x32xbf16>
    %cst_10 = arith.constant dense<0.000000e+00> : vector<8x32xf32>
    %15 = tpu.matmul %13, %14, %cst_10 {dimension_numbers = #tpu.dot_dimension_numbers<[1], [0], [0], [1], [0, 0, 1, 1], [], []>} : vector<8x32xbf16>, vector<32x32xbf16>, vector<8x32xf32> -> vector<8x32xf32>
    %c16 = arith.constant 16 : index
    %c0_11 = arith.constant 0 : index
    %16 = vector.load %arg3[%c16, %c0_11] : memref<232x128xf32, #tpu.memory_space<vmem>>, vector<8x32xf32>
    %17 = arith.addf %15, %16 : vector<8x32xf32>
    %cst_12 = arith.constant dense<0.000000e+00> : vector<8xf32>
    %18 = vector.multi_reduction <add>, %17, %cst_12 [1] : vector<8x32xf32> to vector<8xf32>
    %19 = vector.shape_cast %18 : vector<8xf32> to vector<8x1xf32>
    %cst_13 = arith.constant 3.200000e+01 : f32
    %20 = vector.broadcast %cst_13 : f32 to vector<8x1xf32>
    %21 = arith.divf %19, %20 : vector<8x1xf32>
    %22 = arith.mulf %17, %17 : vector<8x32xf32>
    %cst_14 = arith.constant dense<0.000000e+00> : vector<8xf32>
    %23 = vector.multi_reduction <add>, %22, %cst_14 [1] : vector<8x32xf32> to vector<8xf32>
    %24 = vector.shape_cast %23 : vector<8xf32> to vector<8x1xf32>
    %cst_15 = arith.constant 3.200000e+01 : f32
    %25 = vector.broadcast %cst_15 : f32 to vector<8x1xf32>
    %26 = arith.divf %24, %25 : vector<8x1xf32>
    %27 = arith.mulf %21, %21 : vector<8x1xf32>
    %28 = arith.subf %26, %27 : vector<8x1xf32>
    %cst_16 = arith.constant 0.000000e+00 : f32
    %29 = vector.broadcast %cst_16 : f32 to vector<8x1xf32>
    %30 = arith.maximumf %28, %29 : vector<8x1xf32>
    %cst_17 = arith.constant 9.99999974E-6 : f32
    %31 = vector.broadcast %cst_17 : f32 to vector<8x1xf32>
    %32 = arith.addf %30, %31 : vector<8x1xf32>
    %33 = math.rsqrt %32 : vector<8x1xf32>
    %c24 = arith.constant 24 : index
    %c0_18 = arith.constant 0 : index
    %34 = vector.load %arg3[%c24, %c0_18] : memref<232x128xf32, #tpu.memory_space<vmem>>, vector<8x32xf32>
    %35 = vector.broadcast %33 : vector<8x1xf32> to vector<8x32xf32>
    %36 = arith.mulf %35, %34 : vector<8x32xf32>
    %37 = vector.broadcast %21 : vector<8x1xf32> to vector<8x32xf32>
    %38 = arith.subf %17, %37 : vector<8x32xf32>
    %39 = arith.mulf %38, %36 : vector<8x32xf32>
    %c32_19 = arith.constant 32 : index
    %c0_20 = arith.constant 0 : index
    %40 = vector.load %arg3[%c32_19, %c0_20] : memref<232x128xf32, #tpu.memory_space<vmem>>, vector<8x32xf32>
    %41 = arith.addf %39, %40 : vector<8x32xf32>
    %cst_21 = arith.constant 1.000000e-01 : f32
    %42 = vector.broadcast %cst_21 : f32 to vector<8x32xf32>
    %43 = arith.mulf %42, %41 : vector<8x32xf32>
    %44 = arith.maximumf %41, %43 : vector<8x32xf32>
    %45 = arith.truncf %44 : vector<8x32xf32> to vector<8x32xbf16>
    %c96 = arith.constant 96 : index
    %c0_22 = arith.constant 0 : index
    %46 = vector.load %arg2[%c96, %c0_22] : memref<432x128xbf16, #tpu.memory_space<vmem>>, vector<32x32xbf16>
    %cst_23 = arith.constant dense<0.000000e+00> : vector<8x32xf32>
    %47 = tpu.matmul %45, %46, %cst_23 {dimension_numbers = #tpu.dot_dimension_numbers<[1], [0], [0], [1], [0, 0, 1, 1], [], []>} : vector<8x32xbf16>, vector<32x32xbf16>, vector<8x32xf32> -> vector<8x32xf32>
    %c40 = arith.constant 40 : index
    %c0_24 = arith.constant 0 : index
    %48 = vector.load %arg3[%c40, %c0_24] : memref<232x128xf32, #tpu.memory_space<vmem>>, vector<8x32xf32>
    %49 = arith.addf %47, %48 : vector<8x32xf32>
    %cst_25 = arith.constant dense<0.000000e+00> : vector<8xf32>
    %50 = vector.multi_reduction <add>, %49, %cst_25 [1] : vector<8x32xf32> to vector<8xf32>
    %51 = vector.shape_cast %50 : vector<8xf32> to vector<8x1xf32>
    %cst_26 = arith.constant 3.200000e+01 : f32
    %52 = vector.broadcast %cst_26 : f32 to vector<8x1xf32>
    %53 = arith.divf %51, %52 : vector<8x1xf32>
    %54 = arith.mulf %49, %49 : vector<8x32xf32>
    %cst_27 = arith.constant dense<0.000000e+00> : vector<8xf32>
    %55 = vector.multi_reduction <add>, %54, %cst_27 [1] : vector<8x32xf32> to vector<8xf32>
    %56 = vector.shape_cast %55 : vector<8xf32> to vector<8x1xf32>
    %cst_28 = arith.constant 3.200000e+01 : f32
    %57 = vector.broadcast %cst_28 : f32 to vector<8x1xf32>
    %58 = arith.divf %56, %57 : vector<8x1xf32>
    %59 = arith.mulf %53, %53 : vector<8x1xf32>
    %60 = arith.subf %58, %59 : vector<8x1xf32>
    %cst_29 = arith.constant 0.000000e+00 : f32
    %61 = vector.broadcast %cst_29 : f32 to vector<8x1xf32>
    %62 = arith.maximumf %60, %61 : vector<8x1xf32>
    %cst_30 = arith.constant 9.99999974E-6 : f32
    %63 = vector.broadcast %cst_30 : f32 to vector<8x1xf32>
    %64 = arith.addf %62, %63 : vector<8x1xf32>
    %65 = math.rsqrt %64 : vector<8x1xf32>
    %c48 = arith.constant 48 : index
    %c0_31 = arith.constant 0 : index
    %66 = vector.load %arg3[%c48, %c0_31] : memref<232x128xf32, #tpu.memory_space<vmem>>, vector<8x32xf32>
    %67 = vector.broadcast %65 : vector<8x1xf32> to vector<8x32xf32>
    %68 = arith.mulf %67, %66 : vector<8x32xf32>
    %69 = vector.broadcast %53 : vector<8x1xf32> to vector<8x32xf32>
    %70 = arith.subf %49, %69 : vector<8x32xf32>
    %71 = arith.mulf %70, %68 : vector<8x32xf32>
    %c56 = arith.constant 56 : index
    %c0_32 = arith.constant 0 : index
    %72 = vector.load %arg3[%c56, %c0_32] : memref<232x128xf32, #tpu.memory_space<vmem>>, vector<8x32xf32>
    %73 = arith.addf %71, %72 : vector<8x32xf32>
    %74 = arith.addf %73, %12 : vector<8x32xf32>
    %cst_33 = arith.constant 1.000000e-01 : f32
    %75 = vector.broadcast %cst_33 : f32 to vector<8x32xf32>
    %76 = arith.mulf %75, %74 : vector<8x32xf32>
    %77 = arith.maximumf %74, %76 : vector<8x32xf32>
    %78 = arith.truncf %77 : vector<8x32xf32> to vector<8x32xbf16>
    %c128 = arith.constant 128 : index
    %c0_34 = arith.constant 0 : index
    %79 = vector.load %arg2[%c128, %c0_34] : memref<432x128xbf16, #tpu.memory_space<vmem>>, vector<32x16xbf16>
    %cst_35 = arith.constant dense<0.000000e+00> : vector<8x16xf32>
    %80 = tpu.matmul %78, %79, %cst_35 {dimension_numbers = #tpu.dot_dimension_numbers<[1], [0], [0], [1], [0, 0, 1, 1], [], []>} : vector<8x32xbf16>, vector<32x16xbf16>, vector<8x16xf32> -> vector<8x16xf32>
    %c64_36 = arith.constant 64 : index
    %c0_37 = arith.constant 0 : index
    %81 = vector.load %arg3[%c64_36, %c0_37] : memref<232x128xf32, #tpu.memory_space<vmem>>, vector<8x16xf32>
    %82 = arith.addf %80, %81 : vector<8x16xf32>
    %83 = arith.truncf %82 : vector<8x16xf32> to vector<8x16xbf16>
    %c160 = arith.constant 160 : index
    %c0_38 = arith.constant 0 : index
    %84 = vector.load %arg2[%c160, %c0_38] : memref<432x128xbf16, #tpu.memory_space<vmem>>, vector<16x16xbf16>
    %cst_39 = arith.constant dense<0.000000e+00> : vector<8x16xf32>
    %85 = tpu.matmul %83, %84, %cst_39 {dimension_numbers = #tpu.dot_dimension_numbers<[1], [0], [0], [1], [0, 0, 1, 1], [], []>} : vector<8x16xbf16>, vector<16x16xbf16>, vector<8x16xf32> -> vector<8x16xf32>
    %c72 = arith.constant 72 : index
    %c0_40 = arith.constant 0 : index
    %86 = vector.load %arg3[%c72, %c0_40] : memref<232x128xf32, #tpu.memory_space<vmem>>, vector<8x16xf32>
    %87 = arith.addf %85, %86 : vector<8x16xf32>
    %cst_41 = arith.constant dense<0.000000e+00> : vector<8xf32>
    %88 = vector.multi_reduction <add>, %87, %cst_41 [1] : vector<8x16xf32> to vector<8xf32>
    %89 = vector.shape_cast %88 : vector<8xf32> to vector<8x1xf32>
    %cst_42 = arith.constant 1.600000e+01 : f32
    %90 = vector.broadcast %cst_42 : f32 to vector<8x1xf32>
    %91 = arith.divf %89, %90 : vector<8x1xf32>
    %92 = arith.mulf %87, %87 : vector<8x16xf32>
    %cst_43 = arith.constant dense<0.000000e+00> : vector<8xf32>
    %93 = vector.multi_reduction <add>, %92, %cst_43 [1] : vector<8x16xf32> to vector<8xf32>
    %94 = vector.shape_cast %93 : vector<8xf32> to vector<8x1xf32>
    %cst_44 = arith.constant 1.600000e+01 : f32
    %95 = vector.broadcast %cst_44 : f32 to vector<8x1xf32>
    %96 = arith.divf %94, %95 : vector<8x1xf32>
    %97 = arith.mulf %91, %91 : vector<8x1xf32>
    %98 = arith.subf %96, %97 : vector<8x1xf32>
    %cst_45 = arith.constant 0.000000e+00 : f32
    %99 = vector.broadcast %cst_45 : f32 to vector<8x1xf32>
    %100 = arith.maximumf %98, %99 : vector<8x1xf32>
    %cst_46 = arith.constant 9.99999974E-6 : f32
    %101 = vector.broadcast %cst_46 : f32 to vector<8x1xf32>
    %102 = arith.addf %100, %101 : vector<8x1xf32>
    %103 = math.rsqrt %102 : vector<8x1xf32>
    %c80 = arith.constant 80 : index
    %c0_47 = arith.constant 0 : index
    %104 = vector.load %arg3[%c80, %c0_47] : memref<232x128xf32, #tpu.memory_space<vmem>>, vector<8x16xf32>
    %105 = vector.broadcast %103 : vector<8x1xf32> to vector<8x16xf32>
    %106 = arith.mulf %105, %104 : vector<8x16xf32>
    %107 = vector.broadcast %91 : vector<8x1xf32> to vector<8x16xf32>
    %108 = arith.subf %87, %107 : vector<8x16xf32>
    %109 = arith.mulf %108, %106 : vector<8x16xf32>
    %c88 = arith.constant 88 : index
    %c0_48 = arith.constant 0 : index
    %110 = vector.load %arg3[%c88, %c0_48] : memref<232x128xf32, #tpu.memory_space<vmem>>, vector<8x16xf32>
    %111 = arith.addf %109, %110 : vector<8x16xf32>
    %cst_49 = arith.constant 1.000000e-01 : f32
    %112 = vector.broadcast %cst_49 : f32 to vector<8x16xf32>
    %113 = arith.mulf %112, %111 : vector<8x16xf32>
    %114 = arith.maximumf %111, %113 : vector<8x16xf32>
    %115 = arith.truncf %114 : vector<8x16xf32> to vector<8x16xbf16>
    %c176 = arith.constant 176 : index
    %c0_50 = arith.constant 0 : index
    %116 = vector.load %arg2[%c176, %c0_50] : memref<432x128xbf16, #tpu.memory_space<vmem>>, vector<16x16xbf16>
    %cst_51 = arith.constant dense<0.000000e+00> : vector<8x16xf32>
    %117 = tpu.matmul %115, %116, %cst_51 {dimension_numbers = #tpu.dot_dimension_numbers<[1], [0], [0], [1], [0, 0, 1, 1], [], []>} : vector<8x16xbf16>, vector<16x16xbf16>, vector<8x16xf32> -> vector<8x16xf32>
    %c96_52 = arith.constant 96 : index
    %c0_53 = arith.constant 0 : index
    %118 = vector.load %arg3[%c96_52, %c0_53] : memref<232x128xf32, #tpu.memory_space<vmem>>, vector<8x16xf32>
    %119 = arith.addf %117, %118 : vector<8x16xf32>
    %cst_54 = arith.constant dense<0.000000e+00> : vector<8xf32>
    %120 = vector.multi_reduction <add>, %119, %cst_54 [1] : vector<8x16xf32> to vector<8xf32>
    %121 = vector.shape_cast %120 : vector<8xf32> to vector<8x1xf32>
    %cst_55 = arith.constant 1.600000e+01 : f32
    %122 = vector.broadcast %cst_55 : f32 to vector<8x1xf32>
    %123 = arith.divf %121, %122 : vector<8x1xf32>
    %124 = arith.mulf %119, %119 : vector<8x16xf32>
    %cst_56 = arith.constant dense<0.000000e+00> : vector<8xf32>
    %125 = vector.multi_reduction <add>, %124, %cst_56 [1] : vector<8x16xf32> to vector<8xf32>
    %126 = vector.shape_cast %125 : vector<8xf32> to vector<8x1xf32>
    %cst_57 = arith.constant 1.600000e+01 : f32
    %127 = vector.broadcast %cst_57 : f32 to vector<8x1xf32>
    %128 = arith.divf %126, %127 : vector<8x1xf32>
    %129 = arith.mulf %123, %123 : vector<8x1xf32>
    %130 = arith.subf %128, %129 : vector<8x1xf32>
    %cst_58 = arith.constant 0.000000e+00 : f32
    %131 = vector.broadcast %cst_58 : f32 to vector<8x1xf32>
    %132 = arith.maximumf %130, %131 : vector<8x1xf32>
    %cst_59 = arith.constant 9.99999974E-6 : f32
    %133 = vector.broadcast %cst_59 : f32 to vector<8x1xf32>
    %134 = arith.addf %132, %133 : vector<8x1xf32>
    %135 = math.rsqrt %134 : vector<8x1xf32>
    %c104 = arith.constant 104 : index
    %c0_60 = arith.constant 0 : index
    %136 = vector.load %arg3[%c104, %c0_60] : memref<232x128xf32, #tpu.memory_space<vmem>>, vector<8x16xf32>
    %137 = vector.broadcast %135 : vector<8x1xf32> to vector<8x16xf32>
    %138 = arith.mulf %137, %136 : vector<8x16xf32>
    %139 = vector.broadcast %123 : vector<8x1xf32> to vector<8x16xf32>
    %140 = arith.subf %119, %139 : vector<8x16xf32>
    %141 = arith.mulf %140, %138 : vector<8x16xf32>
    %c112 = arith.constant 112 : index
    %c0_61 = arith.constant 0 : index
    %142 = vector.load %arg3[%c112, %c0_61] : memref<232x128xf32, #tpu.memory_space<vmem>>, vector<8x16xf32>
    %143 = arith.addf %141, %142 : vector<8x16xf32>
    %144 = arith.addf %143, %82 : vector<8x16xf32>
    %cst_62 = arith.constant 1.000000e-01 : f32
    %145 = vector.broadcast %cst_62 : f32 to vector<8x16xf32>
    %146 = arith.mulf %145, %144 : vector<8x16xf32>
    %147 = arith.maximumf %144, %146 : vector<8x16xf32>
    %148 = arith.truncf %147 : vector<8x16xf32> to vector<8x16xbf16>
    %c192 = arith.constant 192 : index
    %c0_63 = arith.constant 0 : index
    %149 = vector.load %arg2[%c192, %c0_63] : memref<432x128xbf16, #tpu.memory_space<vmem>>, vector<16x8xbf16>
    %cst_64 = arith.constant dense<0.000000e+00> : vector<8x8xf32>
    %150 = tpu.matmul %148, %149, %cst_64 {dimension_numbers = #tpu.dot_dimension_numbers<[1], [0], [0], [1], [0, 0, 1, 1], [], []>} : vector<8x16xbf16>, vector<16x8xbf16>, vector<8x8xf32> -> vector<8x8xf32>
    %151 = arith.truncf %150 : vector<8x8xf32> to vector<8x8xbf16>
    %c208 = arith.constant 208 : index
    %c0_65 = arith.constant 0 : index
    %152 = vector.load %arg2[%c208, %c0_65] : memref<432x128xbf16, #tpu.memory_space<vmem>>, vector<8x8xbf16>
    %cst_66 = arith.constant dense<0.000000e+00> : vector<8x8xf32>
    %153 = tpu.matmul %151, %152, %cst_66 {dimension_numbers = #tpu.dot_dimension_numbers<[1], [0], [0], [1], [0, 0, 1, 1], [], []>} : vector<8x8xbf16>, vector<8x8xbf16>, vector<8x8xf32> -> vector<8x8xf32>
    %c120 = arith.constant 120 : index
    %c0_67 = arith.constant 0 : index
    %154 = vector.load %arg3[%c120, %c0_67] : memref<232x128xf32, #tpu.memory_space<vmem>>, vector<8x8xf32>
    %155 = arith.addf %153, %154 : vector<8x8xf32>
    %cst_68 = arith.constant dense<0.000000e+00> : vector<8xf32>
    %156 = vector.multi_reduction <add>, %155, %cst_68 [1] : vector<8x8xf32> to vector<8xf32>
    %157 = vector.shape_cast %156 : vector<8xf32> to vector<8x1xf32>
    %cst_69 = arith.constant 8.000000e+00 : f32
    %158 = vector.broadcast %cst_69 : f32 to vector<8x1xf32>
    %159 = arith.divf %157, %158 : vector<8x1xf32>
    %160 = arith.mulf %155, %155 : vector<8x8xf32>
    %cst_70 = arith.constant dense<0.000000e+00> : vector<8xf32>
    %161 = vector.multi_reduction <add>, %160, %cst_70 [1] : vector<8x8xf32> to vector<8xf32>
    %162 = vector.shape_cast %161 : vector<8xf32> to vector<8x1xf32>
    %cst_71 = arith.constant 8.000000e+00 : f32
    %163 = vector.broadcast %cst_71 : f32 to vector<8x1xf32>
    %164 = arith.divf %162, %163 : vector<8x1xf32>
    %165 = arith.mulf %159, %159 : vector<8x1xf32>
    %166 = arith.subf %164, %165 : vector<8x1xf32>
    %cst_72 = arith.constant 0.000000e+00 : f32
    %167 = vector.broadcast %cst_72 : f32 to vector<8x1xf32>
    %168 = arith.maximumf %166, %167 : vector<8x1xf32>
    %cst_73 = arith.constant 9.99999974E-6 : f32
    %169 = vector.broadcast %cst_73 : f32 to vector<8x1xf32>
    %170 = arith.addf %168, %169 : vector<8x1xf32>
    %171 = math.rsqrt %170 : vector<8x1xf32>
    %c128_74 = arith.constant 128 : index
    %c0_75 = arith.constant 0 : index
    %172 = vector.load %arg3[%c128_74, %c0_75] : memref<232x128xf32, #tpu.memory_space<vmem>>, vector<8x8xf32>
    %173 = vector.broadcast %171 : vector<8x1xf32> to vector<8x8xf32>
    %174 = arith.mulf %173, %172 : vector<8x8xf32>
    %175 = vector.broadcast %159 : vector<8x1xf32> to vector<8x8xf32>
    %176 = arith.subf %155, %175 : vector<8x8xf32>
    %177 = arith.mulf %176, %174 : vector<8x8xf32>
    %c136 = arith.constant 136 : index
    %c0_76 = arith.constant 0 : index
    %178 = vector.load %arg3[%c136, %c0_76] : memref<232x128xf32, #tpu.memory_space<vmem>>, vector<8x8xf32>
    %179 = arith.addf %177, %178 : vector<8x8xf32>
    %cst_77 = arith.constant 1.000000e-01 : f32
    %180 = vector.broadcast %cst_77 : f32 to vector<8x8xf32>
    %181 = arith.mulf %180, %179 : vector<8x8xf32>
    %182 = arith.maximumf %179, %181 : vector<8x8xf32>
    %183 = arith.truncf %182 : vector<8x8xf32> to vector<8x8xbf16>
    %c224 = arith.constant 224 : index
    %c0_78 = arith.constant 0 : index
    %184 = vector.load %arg2[%c224, %c0_78] : memref<432x128xbf16, #tpu.memory_space<vmem>>, vector<8x8xbf16>
    %cst_79 = arith.constant dense<0.000000e+00> : vector<8x8xf32>
    %185 = tpu.matmul %183, %184, %cst_79 {dimension_numbers = #tpu.dot_dimension_numbers<[1], [0], [0], [1], [0, 0, 1, 1], [], []>} : vector<8x8xbf16>, vector<8x8xbf16>, vector<8x8xf32> -> vector<8x8xf32>
    %c144 = arith.constant 144 : index
    %c0_80 = arith.constant 0 : index
    %186 = vector.load %arg3[%c144, %c0_80] : memref<232x128xf32, #tpu.memory_space<vmem>>, vector<8x8xf32>
    %187 = arith.addf %185, %186 : vector<8x8xf32>
    %cst_81 = arith.constant dense<0.000000e+00> : vector<8xf32>
    %188 = vector.multi_reduction <add>, %187, %cst_81 [1] : vector<8x8xf32> to vector<8xf32>
    %189 = vector.shape_cast %188 : vector<8xf32> to vector<8x1xf32>
    %cst_82 = arith.constant 8.000000e+00 : f32
    %190 = vector.broadcast %cst_82 : f32 to vector<8x1xf32>
    %191 = arith.divf %189, %190 : vector<8x1xf32>
    %192 = arith.mulf %187, %187 : vector<8x8xf32>
    %cst_83 = arith.constant dense<0.000000e+00> : vector<8xf32>
    %193 = vector.multi_reduction <add>, %192, %cst_83 [1] : vector<8x8xf32> to vector<8xf32>
    %194 = vector.shape_cast %193 : vector<8xf32> to vector<8x1xf32>
    %cst_84 = arith.constant 8.000000e+00 : f32
    %195 = vector.broadcast %cst_84 : f32 to vector<8x1xf32>
    %196 = arith.divf %194, %195 : vector<8x1xf32>
    %197 = arith.mulf %191, %191 : vector<8x1xf32>
    %198 = arith.subf %196, %197 : vector<8x1xf32>
    %cst_85 = arith.constant 0.000000e+00 : f32
    %199 = vector.broadcast %cst_85 : f32 to vector<8x1xf32>
    %200 = arith.maximumf %198, %199 : vector<8x1xf32>
    %cst_86 = arith.constant 9.99999974E-6 : f32
    %201 = vector.broadcast %cst_86 : f32 to vector<8x1xf32>
    %202 = arith.addf %200, %201 : vector<8x1xf32>
    %203 = math.rsqrt %202 : vector<8x1xf32>
    %c152 = arith.constant 152 : index
    %c0_87 = arith.constant 0 : index
    %204 = vector.load %arg3[%c152, %c0_87] : memref<232x128xf32, #tpu.memory_space<vmem>>, vector<8x8xf32>
    %205 = vector.broadcast %203 : vector<8x1xf32> to vector<8x8xf32>
    %206 = arith.mulf %205, %204 : vector<8x8xf32>
    %207 = vector.broadcast %191 : vector<8x1xf32> to vector<8x8xf32>
    %208 = arith.subf %187, %207 : vector<8x8xf32>
    %209 = arith.mulf %208, %206 : vector<8x8xf32>
    %c160_88 = arith.constant 160 : index
    %c0_89 = arith.constant 0 : index
    %210 = vector.load %arg3[%c160_88, %c0_89] : memref<232x128xf32, #tpu.memory_space<vmem>>, vector<8x8xf32>
    %211 = arith.addf %209, %210 : vector<8x8xf32>
    %212 = arith.addf %211, %150 : vector<8x8xf32>
    %cst_90 = arith.constant 1.000000e-01 : f32
    %213 = vector.broadcast %cst_90 : f32 to vector<8x8xf32>
    %214 = arith.mulf %213, %212 : vector<8x8xf32>
    %215 = arith.maximumf %212, %214 : vector<8x8xf32>
    %216 = arith.truncf %215 : vector<8x8xf32> to vector<8x8xbf16>
    %c240 = arith.constant 240 : index
    %c0_91 = arith.constant 0 : index
    %217 = vector.load %arg2[%c240, %c0_91] : memref<432x128xbf16, #tpu.memory_space<vmem>>, vector<8x4xbf16>
    %cst_92 = arith.constant dense<0.000000e+00> : vector<8x4xf32>
    %218 = tpu.matmul %216, %217, %cst_92 {dimension_numbers = #tpu.dot_dimension_numbers<[1], [0], [0], [1], [0, 0, 1, 1], [], []>} : vector<8x8xbf16>, vector<8x4xbf16>, vector<8x4xf32> -> vector<8x4xf32>
    %219 = arith.truncf %218 : vector<8x4xf32> to vector<8x4xbf16>
    %c256 = arith.constant 256 : index
    %c0_93 = arith.constant 0 : index
    %220 = vector.load %arg2[%c256, %c0_93] : memref<432x128xbf16, #tpu.memory_space<vmem>>, vector<4x4xbf16>
    %cst_94 = arith.constant dense<0.000000e+00> : vector<8x4xf32>
    %221 = tpu.matmul %219, %220, %cst_94 {dimension_numbers = #tpu.dot_dimension_numbers<[1], [0], [0], [1], [0, 0, 1, 1], [], []>} : vector<8x4xbf16>, vector<4x4xbf16>, vector<8x4xf32> -> vector<8x4xf32>
    %c168 = arith.constant 168 : index
    %c0_95 = arith.constant 0 : index
    %222 = vector.load %arg3[%c168, %c0_95] : memref<232x128xf32, #tpu.memory_space<vmem>>, vector<8x4xf32>
    %223 = arith.addf %221, %222 : vector<8x4xf32>
    %cst_96 = arith.constant dense<0.000000e+00> : vector<8xf32>
    %224 = vector.multi_reduction <add>, %223, %cst_96 [1] : vector<8x4xf32> to vector<8xf32>
    %225 = vector.shape_cast %224 : vector<8xf32> to vector<8x1xf32>
    %cst_97 = arith.constant 4.000000e+00 : f32
    %226 = vector.broadcast %cst_97 : f32 to vector<8x1xf32>
    %227 = arith.divf %225, %226 : vector<8x1xf32>
    %228 = arith.mulf %223, %223 : vector<8x4xf32>
    %cst_98 = arith.constant dense<0.000000e+00> : vector<8xf32>
    %229 = vector.multi_reduction <add>, %228, %cst_98 [1] : vector<8x4xf32> to vector<8xf32>
    %230 = vector.shape_cast %229 : vector<8xf32> to vector<8x1xf32>
    %cst_99 = arith.constant 4.000000e+00 : f32
    %231 = vector.broadcast %cst_99 : f32 to vector<8x1xf32>
    %232 = arith.divf %230, %231 : vector<8x1xf32>
    %233 = arith.mulf %227, %227 : vector<8x1xf32>
    %234 = arith.subf %232, %233 : vector<8x1xf32>
    %cst_100 = arith.constant 0.000000e+00 : f32
    %235 = vector.broadcast %cst_100 : f32 to vector<8x1xf32>
    %236 = arith.maximumf %234, %235 : vector<8x1xf32>
    %cst_101 = arith.constant 9.99999974E-6 : f32
    %237 = vector.broadcast %cst_101 : f32 to vector<8x1xf32>
    %238 = arith.addf %236, %237 : vector<8x1xf32>
    %239 = math.rsqrt %238 : vector<8x1xf32>
    %c176_102 = arith.constant 176 : index
    %c0_103 = arith.constant 0 : index
    %240 = vector.load %arg3[%c176_102, %c0_103] : memref<232x128xf32, #tpu.memory_space<vmem>>, vector<8x4xf32>
    %241 = vector.broadcast %239 : vector<8x1xf32> to vector<8x4xf32>
    %242 = arith.mulf %241, %240 : vector<8x4xf32>
    %243 = vector.broadcast %227 : vector<8x1xf32> to vector<8x4xf32>
    %244 = arith.subf %223, %243 : vector<8x4xf32>
    %245 = arith.mulf %244, %242 : vector<8x4xf32>
    %c184 = arith.constant 184 : index
    %c0_104 = arith.constant 0 : index
    %246 = vector.load %arg3[%c184, %c0_104] : memref<232x128xf32, #tpu.memory_space<vmem>>, vector<8x4xf32>
    %247 = arith.addf %245, %246 : vector<8x4xf32>
    %cst_105 = arith.constant 1.000000e-01 : f32
    %248 = vector.broadcast %cst_105 : f32 to vector<8x4xf32>
    %249 = arith.mulf %248, %247 : vector<8x4xf32>
    %250 = arith.maximumf %247, %249 : vector<8x4xf32>
    %251 = arith.truncf %250 : vector<8x4xf32> to vector<8x4xbf16>
    %c272 = arith.constant 272 : index
    %c0_106 = arith.constant 0 : index
    %252 = vector.load %arg2[%c272, %c0_106] : memref<432x128xbf16, #tpu.memory_space<vmem>>, vector<4x4xbf16>
    %cst_107 = arith.constant dense<0.000000e+00> : vector<8x4xf32>
    %253 = tpu.matmul %251, %252, %cst_107 {dimension_numbers = #tpu.dot_dimension_numbers<[1], [0], [0], [1], [0, 0, 1, 1], [], []>} : vector<8x4xbf16>, vector<4x4xbf16>, vector<8x4xf32> -> vector<8x4xf32>
    %c192_108 = arith.constant 192 : index
    %c0_109 = arith.constant 0 : index
    %254 = vector.load %arg3[%c192_108, %c0_109] : memref<232x128xf32, #tpu.memory_space<vmem>>, vector<8x4xf32>
    %255 = arith.addf %253, %254 : vector<8x4xf32>
    %cst_110 = arith.constant dense<0.000000e+00> : vector<8xf32>
    %256 = vector.multi_reduction <add>, %255, %cst_110 [1] : vector<8x4xf32> to vector<8xf32>
    %257 = vector.shape_cast %256 : vector<8xf32> to vector<8x1xf32>
    %cst_111 = arith.constant 4.000000e+00 : f32
    %258 = vector.broadcast %cst_111 : f32 to vector<8x1xf32>
    %259 = arith.divf %257, %258 : vector<8x1xf32>
    %260 = arith.mulf %255, %255 : vector<8x4xf32>
    %cst_112 = arith.constant dense<0.000000e+00> : vector<8xf32>
    %261 = vector.multi_reduction <add>, %260, %cst_112 [1] : vector<8x4xf32> to vector<8xf32>
    %262 = vector.shape_cast %261 : vector<8xf32> to vector<8x1xf32>
    %cst_113 = arith.constant 4.000000e+00 : f32
    %263 = vector.broadcast %cst_113 : f32 to vector<8x1xf32>
    %264 = arith.divf %262, %263 : vector<8x1xf32>
    %265 = arith.mulf %259, %259 : vector<8x1xf32>
    %266 = arith.subf %264, %265 : vector<8x1xf32>
    %cst_114 = arith.constant 0.000000e+00 : f32
    %267 = vector.broadcast %cst_114 : f32 to vector<8x1xf32>
    %268 = arith.maximumf %266, %267 : vector<8x1xf32>
    %cst_115 = arith.constant 9.99999974E-6 : f32
    %269 = vector.broadcast %cst_115 : f32 to vector<8x1xf32>
    %270 = arith.addf %268, %269 : vector<8x1xf32>
    %271 = math.rsqrt %270 : vector<8x1xf32>
    %c200 = arith.constant 200 : index
    %c0_116 = arith.constant 0 : index
    %272 = vector.load %arg3[%c200, %c0_116] : memref<232x128xf32, #tpu.memory_space<vmem>>, vector<8x4xf32>
    %273 = vector.broadcast %271 : vector<8x1xf32> to vector<8x4xf32>
    %274 = arith.mulf %273, %272 : vector<8x4xf32>
    %275 = vector.broadcast %259 : vector<8x1xf32> to vector<8x4xf32>
    %276 = arith.subf %255, %275 : vector<8x4xf32>
    %277 = arith.mulf %276, %274 : vector<8x4xf32>
    %c208_117 = arith.constant 208 : index
    %c0_118 = arith.constant 0 : index
    %278 = vector.load %arg3[%c208_117, %c0_118] : memref<232x128xf32, #tpu.memory_space<vmem>>, vector<8x4xf32>
    %279 = arith.addf %277, %278 : vector<8x4xf32>
    %280 = arith.addf %279, %218 : vector<8x4xf32>
    %cst_119 = arith.constant 1.000000e-01 : f32
    %281 = vector.broadcast %cst_119 : f32 to vector<8x4xf32>
    %282 = arith.mulf %281, %280 : vector<8x4xf32>
    %283 = arith.maximumf %280, %282 : vector<8x4xf32>
    %284 = arith.truncf %283 : vector<8x4xf32> to vector<8x4xbf16>
    %c288 = arith.constant 288 : index
    %c0_120 = arith.constant 0 : index
    %285 = vector.load %arg2[%c288, %c0_120] : memref<432x128xbf16, #tpu.memory_space<vmem>>, vector<4x128xbf16>
    %cst_121 = arith.constant dense<0.000000e+00> : vector<8x128xf32>
    %286 = tpu.matmul %284, %285, %cst_121 {dimension_numbers = #tpu.dot_dimension_numbers<[1], [0], [0], [1], [0, 0, 1, 1], [], []>} : vector<8x4xbf16>, vector<4x128xbf16>, vector<8x128xf32> -> vector<8x128xf32>
    %c216 = arith.constant 216 : index
    %c0_122 = arith.constant 0 : index
    %287 = vector.load %arg3[%c216, %c0_122] : memref<232x128xf32, #tpu.memory_space<vmem>>, vector<8x128xf32>
    %288 = arith.addf %286, %287 : vector<8x128xf32>
    %cst_123 = arith.constant 1.000000e-01 : f32
    %289 = vector.broadcast %cst_123 : f32 to vector<8x128xf32>
    %290 = arith.mulf %289, %288 : vector<8x128xf32>
    %291 = arith.maximumf %288, %290 : vector<8x128xf32>
    %292 = arith.truncf %291 : vector<8x128xf32> to vector<8x128xbf16>
    %c304 = arith.constant 304 : index
    %c0_124 = arith.constant 0 : index
    %293 = vector.load %arg2[%c304, %c0_124] : memref<432x128xbf16, #tpu.memory_space<vmem>>, vector<128x1xbf16>
    %cst_125 = arith.constant dense<0.000000e+00> : vector<8x1xf32>
    %294 = tpu.matmul %292, %293, %cst_125 {dimension_numbers = #tpu.dot_dimension_numbers<[1], [0], [0], [1], [0, 0, 1, 1], [], []>} : vector<8x128xbf16>, vector<128x1xbf16>, vector<8x1xf32> -> vector<8x1xf32>
    %c224_126 = arith.constant 224 : index
    %c0_127 = arith.constant 0 : index
    %295 = vector.load %arg3[%c224_126, %c0_127] : memref<232x128xf32, #tpu.memory_space<vmem>>, vector<8x1xf32>
    %296 = arith.addf %294, %295 : vector<8x1xf32>
    %c0_128 = arith.constant 0 : index
    %c0_129 = arith.constant 0 : index
    %297 = vector.load %arg4[%c0_128, %c0_129] : memref<8x1xf32, #tpu.memory_space<vmem>>, vector<8x1xf32>
    tpu.vector_store %arg4[%c0_128, %c0_129], %296 {strides = array<i32>} : memref<8x1xf32, #tpu.memory_space<vmem>>, vector<8x1xf32>,
    return
  }
  func.func @transform_0(%arg0: i32) -> (i32, i32) {
    %c0_i32 = arith.constant 0 : i32
    %c0_i32_0 = arith.constant 0 : i32
    return %arg0, %c0_i32 : i32, i32
  }
  func.func @transform_1(%arg0: i32) -> (i32, i32) {
    %c0_i32 = arith.constant 0 : i32
    %c0_i32_0 = arith.constant 0 : i32
    %c0_i32_1 = arith.constant 0 : i32
    return %c0_i32, %c0_i32_0 : i32, i32
  }
  func.func @transform_2(%arg0: i32) -> (i32, i32) {
    %c0_i32 = arith.constant 0 : i32
    %c0_i32_0 = arith.constant 0 : i32
    %c0_i32_1 = arith.constant 0 : i32
    return %c0_i32, %c0_i32_0 : i32, i32
  }
  func.func @transform_3(%arg0: i32) -> (i32, i32) {
    %c0_i32 = arith.constant 0 : i32
    %c0_i32_0 = arith.constant 0 : i32
    return %arg0, %c0_i32 : i32, i32
  }
}

</mosaic_0001>

<bundles_post_ra>
// kernel: tpu_custom_call.1
= control target key start
LH: loop header
LB: loop body
LE: loop exit
PB: predicated region body
PF: predicated region fallthrough
CT: control target
= control target key end

     0   :  { %8 = vsyncpa [#allocation3], 0  ;;  %s1606_s0 = inlined_call_operand.hbm [shape: f32[8,24], index: 0, kind: input, shape index: {}]   ;;  %s1607_s1 = inlined_call_operand.hbm [shape: bf16[432,128], index: 1, kind: input, shape index: {}]   ;;  %s1608_s2 = inlined_call_operand.hbm [shape: f32[232,128], index: 2, kind: input, shape index: {}]   ;;  %s1609_s3 = inlined_call_operand.vmem [shape: f32[8,1], index: 3, kind: output, shape index: {}]  }
   0x1   :  { %9 = vsyncpa [#allocation5], 0  ;;  %s1425_s12 = smov [#allocation4]   ;;  %s1355_s16 = scalar_lea.hbm %s1607_s1, 3456 }
   0x2   :  { %s25_s13 = sshll.u32 %s1425_s12, 4  ;;  %p1356_p0 = scmp.ne.s32.totalorder %s1607_s1, %s1355_s16  ;;  %s26_s13 = int_to_ptr.vmem [resolvable:$true] %s25_s13 }
   0x3   :  { %p1359_p1 = scmp.lt.u32.totalorder %s1355_s16, %s1607_s1 }
   0x5   :  { %p1361_p2 = pnand %p1359_p1, %p1356_p0 }
   0x7   :  { %1364 = shalt.err (!%p1361_p2)
}
   0x8   :  { %s1365_s21 = scalar_lea.vmem %s26_s13, 3456  ;;  %p1370_p4 = scmp.lt.s32.totalorder %s26_s13, %s26_s13 }
   0x9   :  { %p1366_p3 = scmp.ne.s32.totalorder %s26_s13, %s1365_s21  ;;  %p1371_p5 = scmp.lt.s32.totalorder %s1365_s21, %s1365_s21 }
   0xb   :  { %p1372_p6 = por %p1371_p5, %p1370_p4 }
   0xd   :  { %p1373_p7 = pnand %p1372_p6, %p1366_p3 }
   0xf   :  { %1376 = shalt.err (!%p1373_p7)
}
  0x10   :  { %s1426_s22 = smov 64   ;;  %s1427_s23 = smov 4  }
  0x11   :  { %31 = dma.hbm_to_vmem [thread:$0]  %s1607_s1, 3456, %s26_s13, [#allocation5], %s1426_s22, %s1426_s22, %s1427_s23  }
  0x12   :  { %s1428_s26 = smov [#allocation2]   ;;  %s1429_s28 = smov [#allocation6]  }
  0x13   :  { %s16_s27 = sshll.u32 %s1428_s26, 4  ;;  %s37_s29 = sshll.u32 %s1429_s28, 4  ;;  %s17_s27 = int_to_ptr.vmem [resolvable:$true] %s16_s27  ;;  %s38_s29 = int_to_ptr.vmem [resolvable:$true] %s37_s29 }
  0x14   :  { %s1377_s5 = scalar_lea.hbm %s1606_s0, 128 }
  0x15   :  { %p1378_p8 = scmp.ne.s32.totalorder %s1606_s0, %s1377_s5  ;;  %p1381_p9 = scmp.lt.u32.totalorder %s1377_s5, %s1606_s0 }
  0x17   :  { %p1383_p10 = pnand %p1381_p9, %p1378_p8 }
  0x19   :  { %1386 = shalt.err (!%p1383_p10)
}
  0x1a   :  { %s1387_s1 = scalar_lea.vmem %s17_s27, 128  ;;  %p1392_p12 = scmp.lt.s32.totalorder %s17_s27, %s17_s27 }
  0x1b   :  { %p1388_p11 = scmp.ne.s32.totalorder %s17_s27, %s1387_s1  ;;  %p1393_p13 = scmp.lt.s32.totalorder %s1387_s1, %s1387_s1 }
  0x1d   :  { %p1394_p0 = por %p1393_p13, %p1392_p12 }
  0x1f   :  { %p1395_p1 = pnand %p1394_p0, %p1388_p11 }
  0x21   :  { %1398 = shalt.err (!%p1395_p1)
}
  0x22   :  { %19 = dma.hbm_to_vmem [thread:$0]  %s1606_s0, 128, %s17_s27, [#allocation3]  }
  0x23   :  { %s1399_s14 = scalar_lea.hbm %s1608_s2, 3712 }
  0x24   :  { %p1400_p2 = scmp.ne.s32.totalorder %s1608_s2, %s1399_s14  ;;  %p1403_p3 = scmp.lt.u32.totalorder %s1399_s14, %s1608_s2 }
  0x26   :  { %p1405_p4 = pnand %p1403_p3, %p1400_p2 }
  0x28   :  { %1408 = shalt.err (!%p1405_p4)
}
  0x29   :  { %s1409_s19 = scalar_lea.vmem %s38_s29, 3712  ;;  %p1414_p6 = scmp.lt.s32.totalorder %s38_s29, %s38_s29 }
  0x2a   :  { %p1410_p5 = scmp.ne.s32.totalorder %s38_s29, %s1409_s19  ;;  %p1415_p7 = scmp.lt.s32.totalorder %s1409_s19, %s1409_s19 }
  0x2c   :  { %p1416_p8 = por %p1415_p7, %p1414_p6 }
  0x2e   :  { %p1417_p9 = pnand %p1416_p8, %p1410_p5 }
  0x30   :  { %1420 = shalt.err (!%p1417_p9)
}
  0x31   :  { %s1430_s0 = smov 128   ;;  %s1431_s20 = smov 8  }
  0x32   :  { %43 = dma.hbm_to_vmem [thread:$0]  %s1608_s2, 3712, %s38_s29, [#allocation5], %s1430_s0, %s1430_s0, %s1431_s20  }
  0x33   :  { %1421 = dma.done.wait [#allocation3], 128  }
  0x34   :  { %1422 = vsyncadd [#allocation3], 4294967168 }
  0x35   :  { %1423 = dma.done.wait [#allocation5], 7168  }
  0x36   :  { %1424 = vsyncadd [#allocation5], 4294960128  ;;  %v1432_v0 = vmov 0.0   ;;  %vm1433_vm0 = vmmov 0   ;;  %v1318_v1 = vld [vmem:[#allocation4] sm:$0xff]   ;;  %vm73_vm1 = vcmask 1043456  }
  0x37   :  { %1195 = vmatprep.subr.bf16.mxu1 %v1432_v0  ;;  %1199 = vmatprep.mubr.msk.bf16.mxu1 %vm1433_vm0, %v1432_v0  ;;  %v1319_v2 = vld [vmem:[#allocation4 + $0x8] ss:$0 sps:$4 sm:$0xff]   ;;  %v54_v3 = vld [vmem:[#allocation2] sm:$0xff]  ;;  %vm69_vm2 = vcmask 195584   ;;  %v1320_v5 = vld [vmem:[#allocation4 + $0x10] sm:$0xff]   ;;  %vm136_vm3 = vcmask 261120  }
  0x38   :  { %1227 = vmatprep.subr.bf16.mxu0 %v1432_v0  ;;  %1231 = vmatprep.mubr.msk.bf16.mxu0 %vm1433_vm0, %v1432_v0  ;;  %v75_v4 = vsel %vm73_vm1, %v1319_v2, 0  ;;  %v55_v6 = vpack.c.bf16 %v54_v3, %v54_v3  ;;  %v1321_v7 = vld [vmem:[#allocation4 + $0x18] sm:$0xff]   ;;  %v1322_v15 = vld [vmem:[#allocation4 + $0x20] sm:$0xff]   ;;  %v1323_v17 = vld [vmem:[#allocation4 + $0x28] sm:$0xff]   ;;  %vm419_vm4 = vcmask 130048   ;;  %vm617_vm5 = vcmask 64512  }
  0x39   :  { %1196 = vmatpush3.bf16.msra.mxu1 %v1318_v1  ;;  %v59_v8 = vld [vmem:[#allocation6] sm:$0xff]  ;;  %v123_v18 = vld [vmem:[#allocation6 + $0x8] sm:$0xff]  ;;  %v185_v25 = vld [vmem:[#allocation6 + $0x10] sm:$0xff]  ;;  %vm814_vm6 = vcmask 1041408   ;;  %vm810_vm7 = vcmask 31744   ;;  %vm1110_vm8 = vcmask 7168  }
  0x3a   :  { %1197 = vmatprep.subr.bf16.mxu1 %v1432_v0  ;;  %v1324_v34 = vld [vmem:[#allocation4 + $0x30] sm:$0xff]   ;;  %v1325_v35 = vld [vmem:[#allocation4 + $0x38] sm:$0xff]   ;;  %v269_v54 = vld [vmem:[#allocation6 + $0x28] sm:$0xff] }
  0x3b   :  { %v256_v44 = vld [vmem:[#allocation6 + $0x18] sm:$0xff]  ;;  %v260_v48 = vld [vmem:[#allocation6 + $0x20] sm:$0xff]  ;;  %v1326_v63 = vld [vmem:[#allocation4 + $0x40] sm:$0xff]  }
  0x3c   :  { %1228 = vmatpush3.bf16.msra.mxu0 %v1326_v63  ;;  %v1327_v1 = vld [vmem:[#allocation4 + $0x48] sm:$0xff]   ;;  %v1328_v2 = vld [vmem:[#allocation4 + $0x50] sm:$0xff]  }
  0x3d   :  { %1198 = vmatpush3.bf16.msra.mxu1 %v75_v4  ;;  %1229 = vmatprep.subr.bf16.mxu0 %v1432_v0 }
  0x3e   :  { %1203 = vmatprep.subr.bf16.mxu1 %v1432_v0 }
  0x40   :  { %1200 = vmatmul.mubr.msk.bf16.vlgmr.msra.gmra.mrb[0].mxu1 %vm69_vm2, %v55_v6  ;;  %1230 = vmatpush3.bf16.msra.mxu0 %v1327_v1 }
  0x41   :  { %1204 = vmatpush3.bf16.msra.mxu1 %v1320_v5  ;;  %1207 = vmatprep.mubr.msk.bf16.mxu1 %vm1433_vm0, %v1432_v0 }
  0x42   :  { %1205 = vmatprep.subr.bf16.mxu1 %v1432_v0  ;;  %1241 = vmatprep.subr.bf16.mxu0 %v1432_v0 }
  0x45   :  { %1206 = vmatpush3.bf16.msra.mxu1 %v1321_v7 }
  0x46   :  { %1211 = vmatprep.subr.bf16.mxu1 %v1432_v0 }
 0x113   :  { %v111_v9 = vpop.f32.mrb[0].mxu1 }
 0x114   :  { %v112_v10 = vadd.f32 %v111_v9, %v59_v8  ;;  %v1201_v11 = vpop.f32.mrb[1].mxu1 }
 0x115   :  { %v114_v12 = vpop.f32.mrb[2].mxu1  ;;  %v339_v11 = vld [vmem:[#allocation6 + $0x30] sm:$0xff] }
 0x116   :  { %v117_v13 = vmax.f32 %v112_v10, 0.0  ;;  %v1202_v14 = vpop.f32.mrb[3].mxu1 }
 0x118   :  { %v118_v16 = vpack.c.bf16 %v117_v13, %v117_v13 }
 0x11a   :  { %1208 = vmatmul.mubr.msk.bf16.vlgmr.msra.gmra.mrb[4].mxu1 %vm136_vm3, %v118_v16 }
 0x11b   :  { %1212 = vmatpush3.bf16.msra.mxu1 %v1322_v15  ;;  %1215 = vmatprep.mubr.msk.bf16.mxu1 %vm1433_vm0, %v1432_v0  ;;  %v343_v15 = vld [vmem:[#allocation6 + $0x38] sm:$0xff] }
 0x11c   :  { %1213 = vmatprep.subr.bf16.mxu1 %v1432_v0 }
 0x11f   :  { %1214 = vmatpush3.bf16.msra.mxu1 %v1323_v17 }
 0x120   :  { %1219 = vmatprep.subr.bf16.mxu1 %v1432_v0 }
 0x1ed   :  { %v174_v19 = vpop.f32.mrb[4].mxu1 }
 0x1ee   :  { %v1508_v20 = vadd.f32 %v174_v19, %v123_v18  ;;  %v1209_v21 = vpop.f32.mrb[5].mxu1 }
 0x1ef   :  { %v177_v22 = vpop.f32.mrb[6].mxu1 }
 0x1f0   :  { %v180_v23 = vpack.c.bf16 %v1508_v20, %v1508_v20  ;;  %v1210_v24 = vpop.f32.mrb[7].mxu1 }
 0x1f2   :  { %1216 = vmatmul.mubr.msk.bf16.vlgmr.msra.gmra.mrb[8].mxu1 %vm136_vm3, %v180_v23  ;;  %v353_v23 = vld [vmem:[#allocation6 + $0x40] sm:$0xff] }
 0x1f3   :  { %1223 = vmatprep.mubr.msk.bf16.mxu1 %vm1433_vm0, %v1432_v0  ;;  %1220 = vmatpush3.bf16.msra.mxu1 %v1324_v34 }
 0x1f4   :  { %1221 = vmatprep.subr.bf16.mxu1 %v1432_v0 }
 0x1f7   :  { %1222 = vmatpush3.bf16.msra.mxu1 %v1325_v35 }
 0x1f8   :  { %1235 = vmatprep.subr.bf16.mxu1 %v1432_v0 }
 0x2c5   :  { %v235_v26 = vpop.f32.mrb[8].mxu1 }
 0x2c6   :  { %v236_v27 = vadd.f32 %v235_v26, %v185_v25  ;;  %v1217_v28 = vpop.f32.mrb[9].mxu1 }
 0x2c7   :  { %v238_v29 = vpop.f32.mrb[10].mxu1 }
 0x2c8   :  { %v1218_v30 = vpop.f32.mrb[11].mxu1  ;;  %v241_v31 = vsel %vm136_vm3, %v236_v27, 0.0  ;;  %v246_v32 = vmul.f32 %v236_v27, %v236_v27 }
 0x2c9   :  { %242 = vadd.xlane.f32.xlu0 %v241_v31 }
 0x2ca   :  { %v247_v33 = vsel %vm136_vm3, %v246_v32, 0.0 }
 0x2cd   :  { %248 = vadd.xlane.f32.xlu0 %v247_v33 }
 0x356   :  { %v243_v36 = vpop.xlane.xlu0 %242 }
 0x357   :  { %v245_v37 = vmul.f32 0.03125, %v243_v36 }
 0x359   :  { %v251_v39 = vmul.f32 %v245_v37, %v245_v37  ;;  %v258_v46 = vsub.f32 %v236_v27, %v245_v37 }
 0x35a   :  { %v249_v38 = vpop.xlane.xlu0 %248 }
 0x35b   :  { %v250_v40 = vmul.f32 0.03125, %v249_v38  ;;  %v1329_v38 = vld [vmem:[#allocation4 + $0x58] sm:$0xff]  }
 0x35d   :  { %v252_v41 = vsub.f32 %v250_v40, %v251_v39 }
 0x35f   :  { %v253_v42 = vmax.f32 %v252_v41, 0.0 }
 0x361   :  { %v254_v43 = vadd.f32 1e-05, %v253_v42 }
 0x363   :  { %1339 = vrsqrt.f32 %v254_v43 }
 0x36d   :  { %v1340_v45 = vpop.eup %1339 }
 0x36e   :  { %v257_v47 = vmul.f32 %v1340_v45, %v256_v44 }
 0x370   :  { %v259_v49 = vmul.f32 %v258_v46, %v257_v47  ;;  %v478_v47 = vld [vmem:[#allocation6 + $0x50] sm:$0xff] }
 0x372   :  { %v261_v50 = vadd.f32 %v260_v48, %v259_v49 }
 0x374   :  { %v262_v51 = vmul.f32 0.1, %v261_v50 }
 0x376   :  { %v263_v52 = vmax.f32 %v261_v50, %v262_v51  ;;  %v482_v51 = vld [vmem:[#allocation6 + $0x58] sm:$0xff] }
 0x378   :  { %v264_v53 = vpack.c.bf16 %v263_v52, %v263_v52 }
 0x37a   :  { %1224 = vmatmul.mubr.msk.bf16.vlgmr.msra.gmra.mrb[12].mxu1 %vm136_vm3, %v264_v53 }
 0x37b   :  { %1237 = vmatprep.mubr.msk.bf16.mxu1 %vm1433_vm0, %v1432_v0  ;;  %1236 = vmatpush3.bf16.msra.mxu1 %v1328_v2 }
 0x37c   :  { %1247 = vmatprep.subr.bf16.mxu1 %v1432_v0 }
 0x44d   :  { %v319_v55 = vpop.f32.mrb[12].mxu1 }
 0x44e   :  { %v320_v56 = vadd.f32 %v319_v55, %v269_v54  ;;  %v1225_v57 = vpop.f32.mrb[13].mxu1 }
 0x44f   :  { %v322_v58 = vpop.f32.mrb[14].mxu1  ;;  %v489_v57 = vld [vmem:[#allocation6 + $0x60] sm:$0xff] }
 0x450   :  { %v1226_v59 = vpop.f32.mrb[15].mxu1  ;;  %v325_v60 = vsel %vm136_vm3, %v320_v56, 0.0  ;;  %v329_v61 = vmul.f32 %v320_v56, %v320_v56 }
 0x451   :  { %326 = vadd.xlane.f32.xlu1 %v325_v60 }
 0x452   :  { %v330_v62 = vsel %vm136_vm3, %v329_v61, 0.0 }
 0x455   :  { %331 = vadd.xlane.f32.xlu1 %v330_v62 }
 0x4de   :  { %v327_v3 = vpop.xlane.xlu1 %326 }
 0x4df   :  { %v328_v4 = vmul.f32 0.03125, %v327_v3  ;;  %v1330_v3 = vld [vmem:[#allocation4 + $0x60] sm:$0xff]  }
 0x4e1   :  { %v334_v6 = vmul.f32 %v328_v4, %v328_v4  ;;  %v341_v13 = vsub.f32 %v320_v56, %v328_v4  ;;  %v615_v4 = vld [vmem:[#allocation4 + $0x68] sm:$0xf] }
 0x4e2   :  { %v332_v5 = vpop.xlane.xlu1 %331 }
 0x4e3   :  { %v333_v7 = vmul.f32 0.03125, %v332_v5  ;;  %v622_v5 = vsel %vm73_vm1, %v615_v4, 0 }
 0x4e5   :  { %v335_v8 = vsub.f32 %v333_v7, %v334_v6 }
 0x4e7   :  { %v336_v9 = vmax.f32 %v335_v8, 0.0 }
 0x4e9   :  { %v337_v10 = vadd.f32 1e-05, %v336_v9 }
 0x4eb   :  { %1341 = vrsqrt.f32 %v337_v10 }
 0x4f5   :  { %v1342_v12 = vpop.eup %1341 }
 0x4f6   :  { %v340_v14 = vmul.f32 %v1342_v12, %v339_v11 }
 0x4f8   :  { %v342_v16 = vmul.f32 %v341_v13, %v340_v14  ;;  %v553_v14 = vld [vmem:[#allocation6 + $0x68] sm:$0xff] }
 0x4fa   :  { %v344_v17 = vadd.f32 %v343_v15, %v342_v16 }
 0x4fc   :  { %v345_v18 = vadd.f32 %v344_v17, %v1508_v20  ;;  %v412_v20 = vld [vmem:[#allocation6 + $0x48] sm:$0xff] }
 0x4fe   :  { %v346_v19 = vmul.f32 0.1, %v345_v18 }
 0x500   :  { %v347_v21 = vmax.f32 %v345_v18, %v346_v19  ;;  %v557_v18 = vld [vmem:[#allocation6 + $0x70] sm:$0xff] }
 0x502   :  { %v348_v22 = vpack.c.bf16 %v347_v21, %v347_v21 }
 0x504   :  { %1232 = vmatmul.mubr.msk.bf16.vlgmr.msra.gmra.mrb[0].mxu0 %vm136_vm3, %v348_v22 }
 0x505   :  { %1243 = vmatprep.mubr.msk.bf16.mxu0 %vm1433_vm0, %v1432_v0  ;;  %1242 = vmatpush3.bf16.msra.mxu0 %v1329_v38 }
 0x506   :  { %1253 = vmatprep.subr.bf16.mxu0 %v1432_v0 }
 0x5d7   :  { %v403_v24 = vpop.f32.mrb[0].mxu0 }
 0x5d8   :  { %v1531_v25 = vadd.f32 %v403_v24, %v353_v23  ;;  %v1233_v26 = vpop.f32.mrb[1].mxu0 }
 0x5d9   :  { %v406_v27 = vpop.f32.mrb[2].mxu0 }
 0x5da   :  { %v409_v28 = vpack.c.bf16 %v1531_v25, %v1531_v25  ;;  %v1234_v29 = vpop.f32.mrb[3].mxu0 }
 0x5dc   :  { %1238 = vmatmul.mubr.msk.bf16.vlgmr.msra.gmra.mrb[16].mxu1 %vm419_vm4, %v409_v28 }
 0x5dd   :  { %1249 = vmatprep.mubr.msk.bf16.mxu1 %vm1433_vm0, %v1432_v0  ;;  %1248 = vmatpush3.bf16.msra.mxu1 %v1330_v3 }
 0x5de   :  { %1259 = vmatprep.subr.bf16.mxu1 %v1432_v0 }
 0x6af   :  { %v457_v30 = vpop.f32.mrb[16].mxu1 }
 0x6b0   :  { %v458_v31 = vadd.f32 %v457_v30, %v412_v20  ;;  %v1239_v32 = vpop.f32.mrb[17].mxu1 }
 0x6b1   :  { %v460_v33 = vpop.f32.mrb[18].mxu1 }
 0x6b2   :  { %v1240_v34 = vpop.f32.mrb[19].mxu1  ;;  %v463_v35 = vsel %vm419_vm4, %v458_v31, 0.0  ;;  %v468_v36 = vmul.f32 %v458_v31, %v458_v31 }
 0x6b3   :  { %464 = vadd.xlane.f32.xlu0 %v463_v35 }
 0x6b4   :  { %v469_v37 = vsel %vm419_vm4, %v468_v36, 0.0 }
 0x6b5   :  { %470 = vadd.xlane.f32.xlu1 %v469_v37 }
 0x740   :  { %v465_v39 = vpop.xlane.xlu0 %464 }
 0x741   :  { %v467_v40 = vmul.f32 0.0625, %v465_v39  ;;  %v688_v39 = vld [vmem:[#allocation4 + $0x70] sm:$0xf] }
 0x742   :  { %v471_v41 = vpop.xlane.xlu1 %470 }
 0x743   :  { %v473_v42 = vmul.f32 %v467_v40, %v467_v40  ;;  %v472_v43 = vmul.f32 0.0625, %v471_v41  ;;  %v480_v49 = vsub.f32 %v458_v31, %v467_v40  ;;  %v694_v40 = vsel %vm73_vm1, %v688_v39, 0 }
 0x745   :  { %v474_v44 = vsub.f32 %v472_v43, %v473_v42 }
 0x747   :  { %v475_v45 = vmax.f32 %v474_v44, 0.0 }
 0x749   :  { %v476_v46 = vadd.f32 1e-05, %v475_v45 }
 0x74b   :  { %1343 = vrsqrt.f32 %v476_v46 }
 0x755   :  { %v1344_v48 = vpop.eup %1343 }
 0x756   :  { %v479_v50 = vmul.f32 %v1344_v48, %v478_v47 }
 0x758   :  { %v481_v52 = vmul.f32 %v480_v49, %v479_v50  ;;  %v679_v49 = vld [vmem:[#allocation6 + $0x80] sm:$0xff] }
 0x75a   :  { %v483_v53 = vadd.f32 %v482_v51, %v481_v52 }
 0x75c   :  { %v484_v54 = vmul.f32 0.1, %v483_v53 }
 0x75e   :  { %v485_v55 = vmax.f32 %v483_v53, %v484_v54  ;;  %v683_v53 = vld [vmem:[#allocation6 + $0x88] sm:$0xff] }
 0x760   :  { %v486_v56 = vpack.c.bf16 %v485_v55, %v485_v55 }
 0x762   :  { %1244 = vmatmul.mubr.msk.bf16.vlgmr.msra.gmra.mrb[4].mxu0 %vm419_vm4, %v486_v56 }
 0x763   :  { %1255 = vmatprep.mubr.msk.bf16.mxu0 %vm1433_vm0, %v1432_v0  ;;  %1254 = vmatpush3.bf16.msra.mxu0 %v622_v5  ;;  %v760_v5 = vld [vmem:[#allocation4 + $0x78] sm:$0xf] }
 0x764   :  { %1265 = vmatprep.subr.bf16.mxu0 %v1432_v0 }
 0x835   :  { %v533_v58 = vpop.f32.mrb[4].mxu0 }
 0x836   :  { %v534_v59 = vadd.f32 %v533_v58, %v489_v57  ;;  %v1245_v60 = vpop.f32.mrb[5].mxu0 }
 0x837   :  { %v536_v61 = vpop.f32.mrb[6].mxu0 }
 0x838   :  { %v1246_v62 = vpop.f32.mrb[7].mxu0  ;;  %v539_v63 = vsel %vm419_vm4, %v534_v59, 0.0  ;;  %v543_v1 = vmul.f32 %v534_v59, %v534_v59 }
 0x839   :  { %540 = vadd.xlane.f32.xlu0 %v539_v63 }
 0x83a   :  { %v544_v2 = vsel %vm419_vm4, %v543_v1, 0.0 }
 0x83b   :  { %545 = vadd.xlane.f32.xlu1 %v544_v2 }
 0x8c6   :  { %v541_v6 = vpop.xlane.xlu0 %540 }
 0x8c7   :  { %v542_v7 = vmul.f32 0.0625, %v541_v6  ;;  %v765_v6 = vsel %vm73_vm1, %v760_v5, 0 }
 0x8c8   :  { %v546_v8 = vpop.xlane.xlu1 %545 }
 0x8c9   :  { %v548_v9 = vmul.f32 %v542_v7, %v542_v7  ;;  %v547_v10 = vmul.f32 0.0625, %v546_v8  ;;  %v555_v16 = vsub.f32 %v534_v59, %v542_v7  ;;  %v689_v59 = vld [vmem:[#allocation6 + $0x90] sm:$0xff]  ;;  %v808_v7 = vld [vmem:[#allocation4 + $0x80] sm:$0x3] }
 0x8ca   :  { %v816_v8 = vsel %vm814_vm6, %v808_v7, 0 }
 0x8cb   :  { %v549_v11 = vsub.f32 %v547_v10, %v548_v9 }
 0x8cd   :  { %v550_v12 = vmax.f32 %v549_v11, 0.0 }
 0x8cf   :  { %v551_v13 = vadd.f32 1e-05, %v550_v12 }
 0x8d1   :  { %1345 = vrsqrt.f32 %v551_v13 }
 0x8db   :  { %v1346_v15 = vpop.eup %1345 }
 0x8dc   :  { %v554_v17 = vmul.f32 %v1346_v15, %v553_v14 }
 0x8de   :  { %v556_v19 = vmul.f32 %v555_v16, %v554_v17  ;;  %v750_v17 = vld [vmem:[#allocation6 + $0x98] sm:$0xff] }
 0x8e0   :  { %v558_v21 = vadd.f32 %v557_v18, %v556_v19 }
 0x8e2   :  { %v559_v22 = vadd.f32 %v558_v21, %v1531_v25  ;;  %v616_v25 = vld [vmem:[#allocation6 + $0x78] sm:$0xff] }
 0x8e4   :  { %v560_v23 = vmul.f32 0.1, %v559_v22 }
 0x8e6   :  { %v561_v24 = vmax.f32 %v559_v22, %v560_v23  ;;  %v754_v22 = vld [vmem:[#allocation6 + $0xa0] sm:$0xff] }
 0x8e8   :  { %v562_v26 = vpack.c.bf16 %v561_v24, %v561_v24 }
 0x8ea   :  { %1250 = vmatmul.mubr.msk.bf16.vlgmr.msra.gmra.mrb[20].mxu1 %vm419_vm4, %v562_v26 }
 0x8eb   :  { %1261 = vmatprep.mubr.msk.bf16.mxu1 %vm1433_vm0, %v1432_v0  ;;  %1260 = vmatpush3.bf16.msra.mxu1 %v694_v40 }
 0x8ec   :  { %1271 = vmatprep.subr.bf16.mxu1 %v1432_v0 }
 0x9bd   :  { %v1553_v27 = vpop.f32.mrb[20].mxu1 }
 0x9be   :  { %v614_v28 = vpack.c.bf16 %v1553_v27, %v1553_v27  ;;  %v1251_v29 = vpop.f32.mrb[21].mxu1 }
 0x9bf   :  { %v611_v20 = vpop.f32.mrb[22].mxu1 }
 0x9c0   :  { %v1252_v30 = vpop.f32.mrb[23].mxu1  ;;  %1256 = vmatmul.mubr.msk.bf16.vlgmr.msra.gmra.mrb[8].mxu0 %vm617_vm5, %v614_v28 }
 0x9c1   :  { %1267 = vmatprep.mubr.msk.bf16.mxu0 %vm1433_vm0, %v1432_v0  ;;  %1266 = vmatpush3.bf16.msra.mxu0 %v765_v6 }
 0x9c2   :  { %1277 = vmatprep.subr.bf16.mxu0 %v1432_v0 }
 0xa93   :  { %v658_v31 = vpop.f32.mrb[8].mxu0 }
 0xa94   :  { %v659_v32 = vadd.f32 %v658_v31, %v616_v25  ;;  %v1257_v33 = vpop.f32.mrb[9].mxu0 }
 0xa95   :  { %v661_v34 = vpop.f32.mrb[10].mxu0 }
 0xa96   :  { %v1258_v35 = vpop.f32.mrb[11].mxu0  ;;  %v664_v36 = vsel %vm617_vm5, %v659_v32, 0.0  ;;  %v669_v37 = vmul.f32 %v659_v32, %v659_v32 }
 0xa97   :  { %665 = vadd.xlane.f32.xlu0 %v664_v36 }
 0xa98   :  { %v670_v38 = vsel %vm617_vm5, %v669_v37, 0.0 }
 0xa99   :  { %671 = vadd.xlane.f32.xlu1 %v670_v38 }
 0xb24   :  { %v666_v41 = vpop.xlane.xlu0 %665 }
 0xb25   :  { %v668_v42 = vmul.f32 0.125, %v666_v41 }
 0xb26   :  { %v672_v43 = vpop.xlane.xlu1 %671 }
 0xb27   :  { %v674_v44 = vmul.f32 %v668_v42, %v668_v42  ;;  %v673_v45 = vmul.f32 0.125, %v672_v43  ;;  %v681_v51 = vsub.f32 %v659_v32, %v668_v42  ;;  %v882_v42 = vld [vmem:[#allocation4 + $0x88] sm:$0x3] }
 0xb28   :  { %v888_v43 = vsel %vm814_vm6, %v882_v42, 0 }
 0xb29   :  { %v675_v46 = vsub.f32 %v673_v45, %v674_v44 }
 0xb2b   :  { %v676_v47 = vmax.f32 %v675_v46, 0.0 }
 0xb2d   :  { %v677_v48 = vadd.f32 1e-05, %v676_v47 }
 0xb2f   :  { %1347 = vrsqrt.f32 %v677_v48 }
 0xb39   :  { %v1348_v50 = vpop.eup %1347 }
 0xb3a   :  { %v680_v52 = vmul.f32 %v1348_v50, %v679_v49 }
 0xb3c   :  { %v682_v54 = vmul.f32 %v681_v51, %v680_v52  ;;  %v873_v52 = vld [vmem:[#allocation6 + $0xb0] sm:$0xff] }
 0xb3e   :  { %v684_v55 = vadd.f32 %v683_v53, %v682_v54 }
 0xb40   :  { %v685_v56 = vmul.f32 0.1, %v684_v55 }
 0xb42   :  { %v686_v57 = vmax.f32 %v684_v55, %v685_v56  ;;  %v877_v56 = vld [vmem:[#allocation6 + $0xb8] sm:$0xff] }
 0xb44   :  { %v687_v58 = vpack.c.bf16 %v686_v57, %v686_v57 }
 0xb46   :  { %1262 = vmatmul.mubr.msk.bf16.vlgmr.msra.gmra.mrb[24].mxu1 %vm617_vm5, %v687_v58 }
 0xb47   :  { %1273 = vmatprep.mubr.msk.bf16.mxu1 %vm1433_vm0, %v1432_v0  ;;  %1272 = vmatpush3.bf16.msra.mxu1 %v816_v8  ;;  %v954_v8 = vld [vmem:[#allocation4 + $0x90] sm:$0x3] }
 0xb48   :  { %1283 = vmatprep.subr.bf16.mxu1 %v1432_v0 }
 0xc19   :  { %v730_v60 = vpop.f32.mrb[24].mxu1 }
 0xc1a   :  { %v731_v61 = vadd.f32 %v730_v60, %v689_v59  ;;  %v1263_v62 = vpop.f32.mrb[25].mxu1 }
 0xc1b   :  { %v733_v63 = vpop.f32.mrb[26].mxu1  ;;  %v883_v62 = vld [vmem:[#allocation6 + $0xc0] sm:$0xff] }
 0xc1c   :  { %v1264_v1 = vpop.f32.mrb[27].mxu1  ;;  %v736_v2 = vsel %vm617_vm5, %v731_v61, 0.0  ;;  %v740_v3 = vmul.f32 %v731_v61, %v731_v61 }
 0xc1d   :  { %737 = vadd.xlane.f32.xlu0 %v736_v2 }
 0xc1e   :  { %v741_v4 = vsel %vm617_vm5, %v740_v3, 0.0 }
 0xc1f   :  { %742 = vadd.xlane.f32.xlu1 %v741_v4 }
 0xcaa   :  { %v738_v9 = vpop.xlane.xlu0 %737 }
 0xcab   :  { %v739_v10 = vmul.f32 0.125, %v738_v9  ;;  %v960_v9 = vsel %vm814_vm6, %v954_v8, 0 }
 0xcac   :  { %v743_v11 = vpop.xlane.xlu1 %742 }
 0xcad   :  { %v745_v12 = vmul.f32 %v739_v10, %v739_v10  ;;  %v744_v13 = vmul.f32 0.125, %v743_v11  ;;  %v752_v19 = vsub.f32 %v731_v61, %v739_v10  ;;  %v1331_v10 = vld [vmem:[#allocation4 + $0x98] sm:$0xff]   ;;  %v1332_v11 = vld [vmem:[#allocation4 + $0xa0] sm:$0xff]  }
 0xcaf   :  { %v746_v14 = vsub.f32 %v744_v13, %v745_v12  ;;  %v1333_v12 = vld [vmem:[#allocation4 + $0xa8] sm:$0xff]   ;;  %v1334_v13 = vld [vmem:[#allocation4 + $0xb0] sm:$0xff]  }
 0xcb1   :  { %v747_v15 = vmax.f32 %v746_v14, 0.0  ;;  %v1335_v14 = vld [vmem:[#allocation4 + $0xb8] sm:$0xff]  }
 0xcb3   :  { %v748_v16 = vadd.f32 1e-05, %v747_v15  ;;  %v1336_v15 = vld [vmem:[#allocation4 + $0xc0] sm:$0xff]  }
 0xcb5   :  { %1349 = vrsqrt.f32 %v748_v16 }
 0xcbf   :  { %v1350_v18 = vpop.eup %1349 }
 0xcc0   :  { %v751_v21 = vmul.f32 %v1350_v18, %v750_v17 }
 0xcc2   :  { %v753_v23 = vmul.f32 %v752_v19, %v751_v21 }
 0xcc4   :  { %v755_v24 = vadd.f32 %v754_v22, %v753_v23 }
 0xcc6   :  { %v756_v26 = vadd.f32 %v755_v24, %v1553_v27  ;;  %v809_v27 = vld [vmem:[#allocation6 + $0xa8] sm:$0xff] }
 0xcc8   :  { %v757_v28 = vmul.f32 0.1, %v756_v26 }
 0xcca   :  { %v758_v29 = vmax.f32 %v756_v26, %v757_v28  ;;  %v944_v26 = vld [vmem:[#allocation6 + $0xc8] sm:$0xff] }
 0xccc   :  { %v759_v20 = vpack.c.bf16 %v758_v29, %v758_v29 }
 0xcce   :  { %1268 = vmatmul.mubr.msk.bf16.vlgmr.msra.gmra.mrb[12].mxu0 %vm617_vm5, %v759_v20 }
 0xccf   :  { %1279 = vmatprep.mubr.msk.bf16.mxu0 %vm1433_vm0, %v1432_v0  ;;  %1278 = vmatpush3.bf16.msra.mxu0 %v888_v43 }
 0xcd0   :  { %1289 = vmatprep.subr.bf16.mxu0 %v1432_v0 }
 0xda1   :  { %v1577_v30 = vpop.f32.mrb[12].mxu0 }
 0xda2   :  { %v807_v25 = vpack.c.bf16 %v1577_v30, %v1577_v30  ;;  %v1269_v31 = vpop.f32.mrb[13].mxu0 }
 0xda3   :  { %v804_v32 = vpop.f32.mrb[14].mxu0 }
 0xda4   :  { %v1270_v33 = vpop.f32.mrb[15].mxu0  ;;  %1274 = vmatmul.mubr.msk.bf16.vlgmr.msra.gmra.mrb[28].mxu1 %vm810_vm7, %v807_v25  ;;  %v948_v25 = vld [vmem:[#allocation6 + $0xd0] sm:$0xff] }
 0xda5   :  { %1285 = vmatprep.mubr.msk.bf16.mxu1 %vm1433_vm0, %v1432_v0  ;;  %1284 = vmatpush3.bf16.msra.mxu1 %v960_v9 }
 0xe77   :  { %v852_v34 = vpop.f32.mrb[28].mxu1 }
 0xe78   :  { %v853_v35 = vadd.f32 %v852_v34, %v809_v27  ;;  %v1275_v36 = vpop.f32.mrb[29].mxu1 }
 0xe79   :  { %v855_v37 = vpop.f32.mrb[30].mxu1  ;;  %v1337_v36 = vld [vmem:[#allocation4 + $0xc8] sm:$0xff]  }
 0xe7a   :  { %v1276_v38 = vpop.f32.mrb[31].mxu1  ;;  %v858_v39 = vsel %vm810_vm7, %v853_v35, 0.0  ;;  %v863_v40 = vmul.f32 %v853_v35, %v853_v35  ;;  %v1338_v37 = vld [vmem:[#allocation4 + $0xd0] sm:$0xff]  }
 0xe7b   :  { %859 = vadd.xlane.f32.xlu0 %v858_v39  ;;  %v955_v38 = vld [vmem:[#allocation6 + $0xd8] sm:$0xff] }
 0xe7c   :  { %v864_v41 = vsel %vm810_vm7, %v863_v40, 0.0 }
 0xe7d   :  { %865 = vadd.xlane.f32.xlu1 %v864_v41 }
 0xf08   :  { %v860_v44 = vpop.xlane.xlu0 %859 }
 0xf09   :  { %v862_v45 = vmul.f32 0.25, %v860_v44 }
 0xf0a   :  { %v866_v46 = vpop.xlane.xlu1 %865 }
 0xf0b   :  { %v868_v47 = vmul.f32 %v862_v45, %v862_v45  ;;  %v867_v48 = vmul.f32 0.25, %v866_v46  ;;  %v875_v54 = vsub.f32 %v853_v35, %v862_v45  ;;  %v1021_v46 = vld [vmem:[#allocation6 + $0xe0] sm:$0xff] }
 0xf0d   :  { %v869_v49 = vsub.f32 %v867_v48, %v868_v47 }
 0xf0f   :  { %v870_v50 = vmax.f32 %v869_v49, 0.0 }
 0xf11   :  { %v871_v51 = vadd.f32 1e-05, %v870_v50 }
 0xf13   :  { %1351 = vrsqrt.f32 %v871_v51 }
 0xf1d   :  { %v1352_v53 = vpop.eup %1351 }
 0xf1e   :  { %v874_v55 = vmul.f32 %v1352_v53, %v873_v52 }
 0xf20   :  { %v876_v57 = vmul.f32 %v875_v54, %v874_v55 }
 0xf22   :  { %v878_v58 = vadd.f32 %v877_v56, %v876_v57 }
 0xf24   :  { %v879_v59 = vmul.f32 0.1, %v878_v58 }
 0xf26   :  { %v880_v60 = vmax.f32 %v878_v58, %v879_v59 }
 0xf28   :  { %v881_v61 = vpack.c.bf16 %v880_v60, %v880_v60 }
 0xf2a   :  { %1280 = vmatmul.mubr.msk.bf16.vlgmr.msra.gmra.mrb[16].mxu0 %vm810_vm7, %v881_v61 }
 0xf2b   :  { %1305 = vmatprep.mubr.msk.bf16.mxu0 %vm1433_vm0, %v1432_v0  ;;  %1290 = vmatpush3.bf16.msra.mxu0 %v1331_v10 }
 0xf2c   :  { %1291 = vmatprep.subr.bf16.mxu0 %v1432_v0 }
 0xf2f   :  { %1292 = vmatpush3.bf16.msra.mxu0 %v1332_v11 }
 0xf30   :  { %1293 = vmatprep.subr.bf16.mxu0 %v1432_v0 }
 0xf33   :  { %1294 = vmatpush3.bf16.msra.mxu0 %v1333_v12 }
 0xf34   :  { %1295 = vmatprep.subr.bf16.mxu0 %v1432_v0 }
 0xf37   :  { %1296 = vmatpush3.bf16.msra.mxu0 %v1334_v13 }
 0xf38   :  { %1297 = vmatprep.subr.bf16.mxu0 %v1432_v0 }
 0xf3b   :  { %1298 = vmatpush3.bf16.msra.mxu0 %v1335_v14 }
 0xf3c   :  { %1299 = vmatprep.subr.bf16.mxu0 %v1432_v0 }
 0xf3f   :  { %1300 = vmatpush3.bf16.msra.mxu0 %v1336_v15 }
 0xf40   :  { %1301 = vmatprep.subr.bf16.mxu0 %v1432_v0 }
 0xf43   :  { %1302 = vmatpush3.bf16.msra.mxu0 %v1337_v36 }
 0xf44   :  { %1303 = vmatprep.subr.bf16.mxu0 %v1432_v0 }
 0xf47   :  { %1304 = vmatpush3.bf16.msra.mxu0 %v1338_v37 }
 0xffd   :  { %v924_v63 = vpop.f32.mrb[16].mxu0 }
 0xffe   :  { %v925_v1 = vadd.f32 %v924_v63, %v883_v62  ;;  %v1281_v2 = vpop.f32.mrb[17].mxu0 }
 0xfff   :  { %v927_v3 = vpop.f32.mrb[18].mxu0 }
0x1000   :  { %v1282_v4 = vpop.f32.mrb[19].mxu0  ;;  %v930_v5 = vsel %vm810_vm7, %v925_v1, 0.0  ;;  %v934_v6 = vmul.f32 %v925_v1, %v925_v1 }
0x1001   :  { %931 = vadd.xlane.f32.xlu0 %v930_v5 }
0x1002   :  { %v935_v7 = vsel %vm810_vm7, %v934_v6, 0.0 }
0x1003   :  { %936 = vadd.xlane.f32.xlu1 %v935_v7 }
0x108e   :  { %v932_v16 = vpop.xlane.xlu0 %931 }
0x108f   :  { %v933_v17 = vmul.f32 0.25, %v932_v16 }
0x1090   :  { %v937_v18 = vpop.xlane.xlu1 %936 }
0x1091   :  { %v939_v19 = vmul.f32 %v933_v17, %v933_v17  ;;  %v938_v21 = vmul.f32 0.25, %v937_v18  ;;  %v946_v29 = vsub.f32 %v925_v1, %v933_v17 }
0x1093   :  { %v940_v22 = vsub.f32 %v938_v21, %v939_v19 }
0x1095   :  { %v941_v23 = vmax.f32 %v940_v22, 0.0 }
0x1097   :  { %v942_v24 = vadd.f32 1e-05, %v941_v23 }
0x1099   :  { %1353 = vrsqrt.f32 %v942_v24 }
0x10a3   :  { %v1354_v28 = vpop.eup %1353 }
0x10a4   :  { %v945_v20 = vmul.f32 %v1354_v28, %v944_v26 }
0x10a6   :  { %v947_v31 = vmul.f32 %v946_v29, %v945_v20 }
0x10a8   :  { %v949_v32 = vadd.f32 %v948_v25, %v947_v31 }
0x10aa   :  { %v950_v33 = vadd.f32 %v949_v32, %v1577_v30 }
0x10ac   :  { %v951_v27 = vmul.f32 0.1, %v950_v33 }
0x10ae   :  { %v952_v34 = vmax.f32 %v950_v33, %v951_v27 }
0x10b0   :  { %v953_v35 = vpack.c.bf16 %v952_v34, %v952_v34 }
0x10b2   :  { %1286 = vmatmul.mubr.msk.bf16.vlgmr.msra.gmra.mrb[32].mxu1 %vm810_vm7, %v953_v35 }
0x1185   :  { %v996_v39 = vpop.f32.mrb[32].mxu1 }
0x1186   :  { %v997_v40 = vadd.f32 %v996_v39, %v955_v38  ;;  %v1287_v41 = vpop.f32.mrb[33].mxu1 }
0x1187   :  { %v999_v42 = vpop.f32.mrb[34].mxu1 }
0x1188   :  { %v1002_v43 = vmul.f32 0.1, %v997_v40  ;;  %v1288_v44 = vpop.f32.mrb[35].mxu1 }
0x118a   :  { %v1003_v45 = vmax.f32 %v997_v40, %v1002_v43 }
0x118c   :  { %v1004_v30 = vpack.c.bf16 %v1003_v45, %v1003_v45 }
0x118e   :  { %1306 = vmatmul.mubr.bf16.vlgmr.msra.gmra.mrb[20].mxu0 %v1004_v30 }
0x1261   :  { %v1104_v47 = vpop.f32.mrb[20].mxu0 }
0x1262   :  { %v1105_v48 = vadd.f32 %v1104_v47, %v1021_v46  ;;  %v1307_v49 = vpop.f32.mrb[21].mxu0 }
0x1263   :  { %v1107_v50 = vpop.f32.mrb[22].mxu0 }
0x1264   :  { %1111 = vst.msk [vmem:[%s1609_s3] sm:$0xff] %vm1110_vm8, %v1105_v48  ;;  %v1308_v0 = vpop.f32.mrb[23].mxu0 }
0x1265   :  { %1116 = vsyncpa [#allocation3], 1 }
0x1266   :  { %1117 = vsyncpa [#allocation5], 1 }

</bundles_post_ra>
